<compile_context>
chip_gen: v7x
topology: tpu7x:2x2x1
jax: 0.10.0
libtpu: 0.0.40
codegen_flags: <defaults>
</compile_context>

<pallas_src>
import jax
import jax.numpy as jnp
from jax.experimental import pallas as pl
from jax.experimental.pallas import tpu as pltpu

IMG = 28 * 28          # 784
HID = 400
IMG_P = 896            # 784 padded to a lane multiple (7 * 128)
HID_P = 512            # 400 padded to a lane multiple (4 * 128)
DEC_FC_VPU_MAX_Z = 4   # use the VPU outer-product only for very small z_dim


def _round_up(a, m):
    return (a + m - 1) // m * m


def vae_kernel(
    x_ref,       # (TB, IMG_P)    bf16  zero-padded flattened image
    w1_ref,      # (IMG_P, HID_P) bf16
    b1_ref,      # (1, HID_P)     f32
    wml_ref,     # (HID_P, 2Z)    bf16  [fc_mu | fc_logvar] fused
    bml_ref,     # (1, 2Z)        f32
    eps_ref,     # (TB, Z)        f32   pre-sampled N(0,1) noise
    wdf_ref,     # (Z, HID_P)     f32   decoder_fc weight (VPU path for tiny Z)
    bdf_ref,     # (1, HID_P)     f32
    wdo_ref,     # (HID_P, IMG_P) bf16
    bdo_ref,     # (1, IMG_P)     f32
    xhat_ref,    # (TB, IMG_P)    f32  out
    stats_ref,   # (TB, STAT_W)   f32  out: [mu | logvar | z | zero-pad] along lanes
):
    Z = eps_ref.shape[-1]
    tb = x_ref.shape[0]

    # encoder: Flatten -> Linear(784, 400) -> ReLU   (bf16 MXU operands, f32 acc)
    h = jnp.dot(x_ref[...], w1_ref[...],
                preferred_element_type=jnp.float32) + b1_ref[...]
    h = jnp.maximum(h, 0.0)

    # fc_mu + fc_logvar fused into a single (HID_P, 2Z) matmul
    ml = jnp.dot(h.astype(jnp.bfloat16), wml_ref[...],
                 preferred_element_type=jnp.float32) + bml_ref[...]
    mu = ml[:, 0:Z]
    logvar = ml[:, Z:2 * Z]

    # reparameterize: z = mu + eps * exp(0.5 * logvar)   (f32 on VPU/EUP)
    z = mu + eps_ref[...] * jnp.exp(0.5 * logvar)

    # decoder_fc: Linear(z_dim, 400) -> ReLU.
    # Tiny contraction dim (Z <= 4) stays on the VPU as a broadcast outer-product;
    # anything bigger goes through the MXU (contraction padding is free slack there).
    if Z <= DEC_FC_VPU_MAX_Z:
        h2 = bdf_ref[...]                                  # (1, HID_P) broadcasts up
        for k in range(Z):                                 # static unroll
            h2 = h2 + z[:, k:k + 1] * wdf_ref[k:k + 1, :]
    else:
        h2 = jnp.dot(z.astype(jnp.bfloat16), wdf_ref[...].astype(jnp.bfloat16),
                     preferred_element_type=jnp.float32) + bdf_ref[...]
    h2 = jnp.maximum(h2, 0.0)

    # decoder_out: Linear(400, 784) -> Sigmoid
    logits = jnp.dot(h2.astype(jnp.bfloat16), wdo_ref[...],
                     preferred_element_type=jnp.float32) + bdo_ref[...]
    xhat_ref[...] = jax.nn.sigmoid(logits)

    # Compose the packed stats slab in-register and write it with ONE unmasked,
    # lane-dense store (no zero-store + masked partial-lane slice stores).
    pad_w = stats_ref.shape[-1] - 3 * Z
    parts = [ml, z]
    if pad_w > 0:
        parts.append(jnp.zeros((tb, pad_w), jnp.float32))
    stats_ref[...] = jnp.concatenate(parts, axis=-1)


def vae_forward(x_nchw, params, eps):
    """x_nchw: (B, 1, 28, 28) f32, eps: (B, z_dim) f32.
    Returns (x_hat, mu, logvar, z) exactly like the torch forward."""
    B = x_nchw.shape[0]
    Z = params["wmu"].shape[1]

    # Flatten and ship bf16 (halves the dominant per-step HBM read).
    x_flat = x_nchw.reshape(B, IMG).astype(jnp.bfloat16)

    # Batch tiling: 8-sublane aligned, up to 256 rows per block.  If the whole
    # (padded) batch would be a single block, halve the tile so the grid has >= 2
    # blocks and the "parallel" axis can shard across both v7x TensorCores.
    TB = min(256, _round_up(max(B, 1), 8))
    B_pad = _round_up(B, TB)
    if B_pad // TB == 1 and TB >= 16:
        TB = _round_up(TB // 2, 8)
        B_pad = _round_up(B, TB)
    num_blocks = B_pad // TB

    # Pad batch and feature dims (zero padding keeps the math exact).
    x_flat = jnp.pad(x_flat, ((0, B_pad - B), (0, IMG_P - IMG)))
    eps_p = jnp.pad(eps, ((0, B_pad - B), (0, 0))) if B_pad != B else eps

    STAT_W = max(128, _round_up(3 * Z, 128))               # lane-dense stats slab

    # Pack / cast / pad weights once (bf16 MXU operands, f32 biases).
    def pad2(a, rows, cols):
        return jnp.pad(a, ((0, rows - a.shape[0]), (0, cols - a.shape[1])))

    w1 = pad2(params["w1"], IMG_P, HID_P).astype(jnp.bfloat16)
    b1 = pad2(params["b1"], 1, HID_P)
    wml = pad2(jnp.concatenate([params["wmu"], params["wlv"]], axis=1),
               HID_P, 2 * Z).astype(jnp.bfloat16)
    bml = jnp.concatenate([params["bmu"], params["blv"]], axis=1)
    wdf = pad2(params["wdf"], Z, HID_P)
    bdf = pad2(params["bdf"], 1, HID_P)
    wdo = pad2(params["wdo"], HID_P, IMG_P).astype(jnp.bfloat16)
    bdo = pad2(params["bdo"], 1, IMG_P)

    row = lambda i: (i, 0)     # blocked along batch
    const = lambda i: (0, 0)   # resident across the whole grid

    in_specs = [
        pl.BlockSpec((TB, IMG_P), row),        # x (bf16)
        pl.BlockSpec(w1.shape, const),
        pl.BlockSpec(b1.shape, const),
        pl.BlockSpec(wml.shape, const),
        pl.BlockSpec(bml.shape, const),
        pl.BlockSpec((TB, Z), row),            # eps
        pl.BlockSpec(wdf.shape, const),
        pl.BlockSpec(bdf.shape, const),
        pl.BlockSpec(wdo.shape, const),
        pl.BlockSpec(bdo.shape, const),
    ]
    out_specs = (
        pl.BlockSpec((TB, IMG_P), row),        # x_hat (flat, padded)
        pl.BlockSpec((TB, STAT_W), row),       # packed [mu | logvar | z]
    )
    out_shape = (
        jax.ShapeDtypeStruct((B_pad, IMG_P), jnp.float32),
        jax.ShapeDtypeStruct((B_pad, STAT_W), jnp.float32),
    )

    # VMEM budget: weights are constant-indexed (DMA'd once, counted once);
    # per-batch activation blocks are double-buffered; plus headroom.
    weight_bytes = sum(int(a.size) * a.dtype.itemsize
                       for a in (w1, b1, wml, bml, wdf, bdf, wdo, bdo))
    block_bytes = TB * IMG_P * 2 + TB * Z * 4 + TB * IMG_P * 4 + TB * STAT_W * 4
    vmem_limit = weight_bytes + 2 * block_bytes + (16 << 20)

    # TODO(synk): if profiling still shows the x DMA exposed at short grids, add
    # pipeline_mode=pl.Buffered(3) to the x BlockSpec (plenty of VMEM headroom).
    xhat_flat, stats = pl.pallas_call(
        vae_kernel,
        grid=(num_blocks,),
        in_specs=in_specs,
        out_specs=out_specs,
        out_shape=out_shape,
        compiler_params=pltpu.CompilerParams(
            dimension_semantics=("parallel",),
            vmem_limit_bytes=int(vmem_limit),
        ),
    )(x_flat, w1, b1, wml, bml, eps_p, wdf, bdf, wdo, bdo)

    x_hat = xhat_flat[:B, :IMG].reshape(-1, 1, 28, 28)   # .view(-1, 1, 28, 28)
    mu = stats[:B, 0:Z]
    logvar = stats[:B, Z:2 * Z]
    z = stats[:B, 2 * Z:3 * Z]
    return x_hat, mu, logvar, z


def init_params(key, z_dim=1):
    """torch.nn.Linear-style init: U(-1/sqrt(fan_in), 1/sqrt(fan_in)).
    Weights stored transposed ((in, out)) so the kernel computes x @ W + b."""
    def linear(k, fan_in, fan_out):
        kw, kb = jax.random.split(k)
        bound = 1.0 / (fan_in ** 0.5)
        w = jax.random.uniform(kw, (fan_in, fan_out), jnp.float32, -bound, bound)
        b = jax.random.uniform(kb, (1, fan_out), jnp.float32, -bound, bound)
        return w, b

    k1, k2, k3, k4, k5 = jax.random.split(key, 5)
    w1, b1 = linear(k1, IMG, HID)        # encoder Linear
    wmu, bmu = linear(k2, HID, z_dim)    # fc_mu
    wlv, blv = linear(k3, HID, z_dim)    # fc_logvar
    wdf, bdf = linear(k4, z_dim, HID)    # decoder_fc Linear
    wdo, bdo = linear(k5, HID, IMG)      # decoder_out Linear
    return dict(w1=w1, b1=b1, wmu=wmu, bmu=bmu, wlv=wlv, blv=blv,
                wdf=wdf, bdf=bdf, wdo=wdo, bdo=bdo)


if __name__ == "__main__":
    key = jax.random.PRNGKey(0)
    k_params, k_x, k_eps = jax.random.split(key, 3)

    B, z_dim = 2, 1
    params = init_params(k_params, z_dim=z_dim)
    x = jax.random.uniform(k_x, (B, 1, 28, 28), jnp.float32)   # MNIST-like input in [0,1)
    # TODO(synk): torch.randn_like samples noise inside the module; here the N(0,1)
    # noise is pre-sampled on the host and passed in explicitly.
    eps = jax.random.normal(k_eps, (B, z_dim), jnp.float32)

    x_hat, mu, logvar, z = vae_forward(x, params, eps)
    jax.block_until_ready((x_hat, mu, logvar, z))

    # pure-JAX reference mirroring the kernel's bf16 MXU operands / f32 accumulation
    def ref_forward(xin, p, e):
        bf = jnp.bfloat16
        xf = xin.reshape(xin.shape[0], -1).astype(bf)
        h = jnp.maximum(jnp.dot(xf, p["w1"].astype(bf),
                                preferred_element_type=jnp.float32) + p["b1"], 0.0)
        hb = h.astype(bf)
        rmu = jnp.dot(hb, p["wmu"].astype(bf),
                      preferred_element_type=jnp.float32) + p["bmu"]
        rlv = jnp.dot(hb, p["wlv"].astype(bf),
                      preferred_element_type=jnp.float32) + p["blv"]
        rz = rmu + e * jnp.exp(0.5 * rlv)
        if rz.shape[-1] <= DEC_FC_VPU_MAX_Z:
            h2 = jnp.maximum(rz @ p["wdf"] + p["bdf"], 0.0)            # f32 VPU path
        else:
            h2 = jnp.maximum(jnp.dot(rz.astype(bf), p["wdf"].astype(bf),
                                     preferred_element_type=jnp.float32)
                             + p["bdf"], 0.0)                          # bf16 MXU path
        xh = jax.nn.sigmoid(jnp.dot(h2.astype(bf), p["wdo"].astype(bf),
                                    preferred_element_type=jnp.float32) + p["bdo"])
        return xh.reshape(-1, 1, 28, 28), rmu, rlv, rz

    rxh, rmu, rlv, rz = ref_forward(x, params, eps)
    assert x_hat.shape == (B, 1, 28, 28) and mu.shape == (B, z_dim)
    assert logvar.shape == (B, z_dim) and z.shape == (B, z_dim)
    assert jnp.allclose(x_hat, rxh, atol=1e-3, rtol=1e-3)
    assert jnp.allclose(mu, rmu, atol=1e-3, rtol=1e-3)
    assert jnp.allclose(logvar, rlv, atol=1e-3, rtol=1e-3)
    assert jnp.allclose(z, rz, atol=1e-3, rtol=1e-3)

    print("KERNEL_OK")
</pallas_src>

<mosaic_0001>
module attributes {stable_mosaic.version = 11 : i64} {
  func.func @vae_kernel(%arg0: i32, %arg1: memref<8x896xbf16, #tpu.memory_space<vmem>>, %arg2: memref<896x512xbf16, #tpu.memory_space<vmem>>, %arg3: memref<1x512xf32, #tpu.memory_space<vmem>>, %arg4: memref<512x2xbf16, #tpu.memory_space<vmem>>, %arg5: memref<1x2xf32, #tpu.memory_space<vmem>>, %arg6: memref<8x1xf32, #tpu.memory_space<vmem>>, %arg7: memref<1x512xf32, #tpu.memory_space<vmem>>, %arg8: memref<1x512xf32, #tpu.memory_space<vmem>>, %arg9: memref<512x896xbf16, #tpu.memory_space<vmem>>, %arg10: memref<1x896xf32, #tpu.memory_space<vmem>>, %arg11: memref<8x896xf32, #tpu.memory_space<vmem>>, %arg12: memref<8x128xf32, #tpu.memory_space<vmem>>) attributes {dimension_semantics = [#tpu.dimension_semantics<parallel>], iteration_bounds = array<i64: 1>, scalar_prefetch = 0 : i64, scratch_operands = 0 : i64, tpu.core_type = #tpu.core_type<tc>, window_params = [{transform_indices = @transform_0, window_bounds = array<i64: 8, 896>}, {pipeline_mode = #tpu.pipeline_mode<synchronous>, transform_indices = @transform_1, window_bounds = array<i64: 896, 512>}, {pipeline_mode = #tpu.pipeline_mode<synchronous>, transform_indices = @transform_2, window_bounds = array<i64: 1, 512>}, {pipeline_mode = #tpu.pipeline_mode<synchronous>, transform_indices = @transform_3, window_bounds = array<i64: 512, 2>}, {pipeline_mode = #tpu.pipeline_mode<synchronous>, transform_indices = @transform_4, window_bounds = array<i64: 1, 2>}, {transform_indices = @transform_5, window_bounds = array<i64: 8, 1>}, {pipeline_mode = #tpu.pipeline_mode<synchronous>, transform_indices = @transform_6, window_bounds = array<i64: 1, 512>}, {pipeline_mode = #tpu.pipeline_mode<synchronous>, transform_indices = @transform_7, window_bounds = array<i64: 1, 512>}, {pipeline_mode = #tpu.pipeline_mode<synchronous>, transform_indices = @transform_8, window_bounds = array<i64: 512, 896>}, {pipeline_mode = #tpu.pipeline_mode<synchronous>, transform_indices = @transform_9, window_bounds = array<i64: 1, 896>}, {transform_indices = @transform_10, window_bounds = array<i64: 8, 896>}, {transform_indices = @transform_11, window_bounds = array<i64: 8, 128>}]} {
    %c0 = arith.constant 0 : index
    %c0_0 = arith.constant 0 : index
    %0 = vector.load %arg1[%c0, %c0_0] : memref<8x896xbf16, #tpu.memory_space<vmem>>, vector<8x896xbf16>
    %c0_1 = arith.constant 0 : index
    %c0_2 = arith.constant 0 : index
    %1 = vector.load %arg2[%c0_1, %c0_2] : memref<896x512xbf16, #tpu.memory_space<vmem>>, vector<896x512xbf16>
    %cst = arith.constant dense<0.000000e+00> : vector<8x512xf32>
    %2 = tpu.matmul %0, %1, %cst {dimension_numbers = #tpu.dot_dimension_numbers<[1], [0], [0], [1], [0, 0, 1, 1], [], []>} : vector<8x896xbf16>, vector<896x512xbf16>, vector<8x512xf32> -> vector<8x512xf32>
    %c0_3 = arith.constant 0 : index
    %c0_4 = arith.constant 0 : index
    %3 = vector.load %arg3[%c0_3, %c0_4] : memref<1x512xf32, #tpu.memory_space<vmem>>, vector<1x512xf32>
    %4 = vector.broadcast %3 : vector<1x512xf32> to vector<8x512xf32>
    %5 = arith.addf %2, %4 : vector<8x512xf32>
    %cst_5 = arith.constant 0.000000e+00 : f32
    %6 = vector.broadcast %cst_5 : f32 to vector<8x512xf32>
    %7 = arith.maximumf %5, %6 : vector<8x512xf32>
    %8 = arith.truncf %7 : vector<8x512xf32> to vector<8x512xbf16>
    %c0_6 = arith.constant 0 : index
    %c0_7 = arith.constant 0 : index
    %9 = vector.load %arg4[%c0_6, %c0_7] : memref<512x2xbf16, #tpu.memory_space<vmem>>, vector<512x2xbf16>
    %cst_8 = arith.constant dense<0.000000e+00> : vector<8x2xf32>
    %10 = tpu.matmul %8, %9, %cst_8 {dimension_numbers = #tpu.dot_dimension_numbers<[1], [0], [0], [1], [0, 0, 1, 1], [], []>} : vector<8x512xbf16>, vector<512x2xbf16>, vector<8x2xf32> -> vector<8x2xf32>
    %c0_9 = arith.constant 0 : index
    %c0_10 = arith.constant 0 : index
    %11 = vector.load %arg5[%c0_9, %c0_10] : memref<1x2xf32, #tpu.memory_space<vmem>>, vector<1x2xf32>
    %12 = vector.broadcast %11 : vector<1x2xf32> to vector<8x2xf32>
    %13 = arith.addf %10, %12 : vector<8x2xf32>
    %14 = vector.extract_strided_slice %13 {offsets = [0, 0], sizes = [8, 1], strides = [1, 1]} : vector<8x2xf32> to vector<8x1xf32>
    %15 = vector.extract_strided_slice %13 {offsets = [0, 1], sizes = [8, 1], strides = [1, 1]} : vector<8x2xf32> to vector<8x1xf32>
    %c0_11 = arith.constant 0 : index
    %c0_12 = arith.constant 0 : index
    %16 = vector.load %arg6[%c0_11, %c0_12] : memref<8x1xf32, #tpu.memory_space<vmem>>, vector<8x1xf32>
    %cst_13 = arith.constant 5.000000e-01 : f32
    %17 = vector.broadcast %cst_13 : f32 to vector<8x1xf32>
    %18 = arith.mulf %17, %15 : vector<8x1xf32>
    %19 = math.exp %18 : vector<8x1xf32>
    %20 = arith.mulf %16, %19 : vector<8x1xf32>
    %21 = arith.addf %14, %20 : vector<8x1xf32>
    %c0_14 = arith.constant 0 : index
    %c0_15 = arith.constant 0 : index
    %22 = vector.load %arg8[%c0_14, %c0_15] : memref<1x512xf32, #tpu.memory_space<vmem>>, vector<1x512xf32>
    %c0_16 = arith.constant 0 : index
    %c0_17 = arith.constant 0 : index
    %23 = vector.load %arg7[%c0_16, %c0_17] : memref<1x512xf32, #tpu.memory_space<vmem>>, vector<1x512xf32>
    %24 = vector.broadcast %21 : vector<8x1xf32> to vector<8x512xf32>
    %25 = vector.broadcast %23 : vector<1x512xf32> to vector<8x512xf32>
    %26 = arith.mulf %24, %25 : vector<8x512xf32>
    %27 = vector.broadcast %22 : vector<1x512xf32> to vector<8x512xf32>
    %28 = arith.addf %27, %26 : vector<8x512xf32>
    %cst_18 = arith.constant 0.000000e+00 : f32
    %29 = vector.broadcast %cst_18 : f32 to vector<8x512xf32>
    %30 = arith.maximumf %28, %29 : vector<8x512xf32>
    %31 = arith.truncf %30 : vector<8x512xf32> to vector<8x512xbf16>
    %c0_19 = arith.constant 0 : index
    %c0_20 = arith.constant 0 : index
    %32 = vector.load %arg9[%c0_19, %c0_20] : memref<512x896xbf16, #tpu.memory_space<vmem>>, vector<512x896xbf16>
    %cst_21 = arith.constant dense<0.000000e+00> : vector<8x896xf32>
    %33 = tpu.matmul %31, %32, %cst_21 {dimension_numbers = #tpu.dot_dimension_numbers<[1], [0], [0], [1], [0, 0, 1, 1], [], []>} : vector<8x512xbf16>, vector<512x896xbf16>, vector<8x896xf32> -> vector<8x896xf32>
    %c0_22 = arith.constant 0 : index
    %c0_23 = arith.constant 0 : index
    %34 = vector.load %arg10[%c0_22, %c0_23] : memref<1x896xf32, #tpu.memory_space<vmem>>, vector<1x896xf32>
    %35 = vector.broadcast %34 : vector<1x896xf32> to vector<8x896xf32>
    %36 = arith.addf %33, %35 : vector<8x896xf32>
    %37 = arith.negf %36 : vector<8x896xf32>
    %38 = math.exp %37 : vector<8x896xf32>
    %cst_24 = arith.constant 1.000000e+00 : f32
    %39 = vector.broadcast %cst_24 : f32 to vector<8x896xf32>
    %40 = arith.addf %39, %38 : vector<8x896xf32>
    %41 = arith.divf %39, %40 : vector<8x896xf32>
    %c0_25 = arith.constant 0 : index
    %c0_26 = arith.constant 0 : index
    %42 = vector.load %arg11[%c0_25, %c0_26] : memref<8x896xf32, #tpu.memory_space<vmem>>, vector<8x896xf32>
    tpu.vector_store %arg11[%c0_25, %c0_26], %41 {strides = array<i32>} : memref<8x896xf32, #tpu.memory_space<vmem>>, vector<8x896xf32>,
    %cst_27 = arith.constant 0.000000e+00 : f32
    %43 = vector.broadcast %cst_27 : f32 to vector<8x125xf32>
    %44 = tpu.concatenate %13, %21, %43 in 1 : vector<8x2xf32>, vector<8x1xf32>, vector<8x125xf32> -> vector<8x128xf32>
    %c0_28 = arith.constant 0 : index
    %c0_29 = arith.constant 0 : index
    %45 = vector.load %arg12[%c0_28, %c0_29] : memref<8x128xf32, #tpu.memory_space<vmem>>, vector<8x128xf32>
    tpu.vector_store %arg12[%c0_28, %c0_29], %44 {strides = array<i32>} : memref<8x128xf32, #tpu.memory_space<vmem>>, vector<8x128xf32>,
    return
  }
  func.func @transform_0(%arg0: i32) -> (i32, i32) {
    %c0_i32 = arith.constant 0 : i32
    %c0_i32_0 = arith.constant 0 : i32
    return %arg0, %c0_i32 : i32, i32
  }
  func.func @transform_1(%arg0: i32) -> (i32, i32) {
    %c0_i32 = arith.constant 0 : i32
    %c0_i32_0 = arith.constant 0 : i32
    %c0_i32_1 = arith.constant 0 : i32
    return %c0_i32, %c0_i32_0 : i32, i32
  }
  func.func @transform_2(%arg0: i32) -> (i32, i32) {
    %c0_i32 = arith.constant 0 : i32
    %c0_i32_0 = arith.constant 0 : i32
    %c0_i32_1 = arith.constant 0 : i32
    return %c0_i32, %c0_i32_0 : i32, i32
  }
  func.func @transform_3(%arg0: i32) -> (i32, i32) {
    %c0_i32 = arith.constant 0 : i32
    %c0_i32_0 = arith.constant 0 : i32
    %c0_i32_1 = arith.constant 0 : i32
    return %c0_i32, %c0_i32_0 : i32, i32
  }
  func.func @transform_4(%arg0: i32) -> (i32, i32) {
    %c0_i32 = arith.constant 0 : i32
    %c0_i32_0 = arith.constant 0 : i32
    %c0_i32_1 = arith.constant 0 : i32
    return %c0_i32, %c0_i32_0 : i32, i32
  }
  func.func @transform_5(%arg0: i32) -> (i32, i32) {
    %c0_i32 = arith.constant 0 : i32
    %c0_i32_0 = arith.constant 0 : i32
    return %arg0, %c0_i32 : i32, i32
  }
  func.func @transform_6(%arg0: i32) -> (i32, i32) {
    %c0_i32 = arith.constant 0 : i32
    %c0_i32_0 = arith.constant 0 : i32
    %c0_i32_1 = arith.constant 0 : i32
    return %c0_i32, %c0_i32_0 : i32, i32
  }
  func.func @transform_7(%arg0: i32) -> (i32, i32) {
    %c0_i32 = arith.constant 0 : i32
    %c0_i32_0 = arith.constant 0 : i32
    %c0_i32_1 = arith.constant 0 : i32
    return %c0_i32, %c0_i32_0 : i32, i32
  }
  func.func @transform_8(%arg0: i32) -> (i32, i32) {
    %c0_i32 = arith.constant 0 : i32
    %c0_i32_0 = arith.constant 0 : i32
    %c0_i32_1 = arith.constant 0 : i32
    return %c0_i32, %c0_i32_0 : i32, i32
  }
  func.func @transform_9(%arg0: i32) -> (i32, i32) {
    %c0_i32 = arith.constant 0 : i32
    %c0_i32_0 = arith.constant 0 : i32
    %c0_i32_1 = arith.constant 0 : i32
    return %c0_i32, %c0_i32_0 : i32, i32
  }
  func.func @transform_10(%arg0: i32) -> (i32, i32) {
    %c0_i32 = arith.constant 0 : i32
    %c0_i32_0 = arith.constant 0 : i32
    return %arg0, %c0_i32 : i32, i32
  }
  func.func @transform_11(%arg0: i32) -> (i32, i32) {
    %c0_i32 = arith.constant 0 : i32
    %c0_i32_0 = arith.constant 0 : i32
    return %arg0, %c0_i32 : i32, i32
  }
}

</mosaic_0001>

<bundles_post_ra>
// kernel: tpu_custom_call.1
= control target key start
LH: loop header
LB: loop body
LE: loop exit
PB: predicated region body
PF: predicated region fallthrough
CT: control target
= control target key end

     0   :  { %17 = vsyncpa [#allocation3], 0  ;;  %s5891_s0 = inlined_call_operand.vmem [shape: bf16[8,896], index: 0, kind: input, shape index: {}]   ;;  %s5892_s1 = inlined_call_operand.hbm [shape: bf16[896,512], index: 1, kind: input, shape index: {}]   ;;  %s5893_s2 = inlined_call_operand.vmem [shape: f32[1,512], index: 2, kind: input, shape index: {}]   ;;  %s5894_s3 = inlined_call_operand.vmem [shape: bf16[512,2], index: 3, kind: input, shape index: {}]   ;;  %s5895_s4 = inlined_call_operand.vmem [shape: f32[1,2], index: 4, kind: input, shape index: {}]   ;;  %s5896_s5 = inlined_call_operand.vmem [shape: f32[8,1], index: 5, kind: input, shape index: {}]   ;;  %s5897_s6 = inlined_call_operand.vmem [shape: f32[1,512], index: 6, kind: input, shape index: {}]   ;;  %s5898_s7 = inlined_call_operand.vmem [shape: f32[1,512], index: 7, kind: input, shape index: {}]   ;;  %s5899_s8 = inlined_call_operand.hbm [shape: bf16[512,896], index: 8, kind: input, shape index: {}]   ;;  %s5900_s9 = inlined_call_operand.vmem [shape: f32[1,896], index: 9, kind: input, shape index: {}]   ;;  %s5901_s10 = inlined_call_operand.hbm [shape: f32[8,896], index: 10, kind: output, shape index: {0}]   ;;  %s5902_s11 = inlined_call_operand.hbm [shape: f32[8,128], index: 11, kind: output, shape index: {1}]  }
   0x1   :  { %18 = vsyncpa [#allocation6], 0 }
   0x2   :  { %19 = vsyncpa [#allocation4], 0 }
   0x3   :  { %20 = vsyncpa [#allocation9], 0  ;;  %s5536_s17 = smov [#allocation2]   ;;  %s5440_s21 = scalar_lea.hbm %s5892_s1, 28672 }
   0x4   :  { %s28_s18 = sshll.u32 %s5536_s17, 4  ;;  %p5441_p0 = scmp.ne.s32.totalorder %s5892_s1, %s5440_s21  ;;  %s29_s18 = int_to_ptr.vmem [resolvable:$true] %s28_s18 }
   0x5   :  { %p5444_p1 = scmp.lt.u32.totalorder %s5440_s21, %s5892_s1 }
   0x7   :  { %p5446_p2 = pnand %p5444_p1, %p5441_p0 }
   0x9   :  { %5449 = shalt.err (!%p5446_p2)
}
   0xa   :  { %s5450_s26 = scalar_lea.vmem %s29_s18, 28672  ;;  %p5455_p4 = scmp.lt.s32.totalorder %s29_s18, %s29_s18 }
   0xb   :  { %p5451_p3 = scmp.ne.s32.totalorder %s29_s18, %s5450_s26  ;;  %p5456_p5 = scmp.lt.s32.totalorder %s5450_s26, %s5450_s26 }
   0xd   :  { %p5457_p6 = por %p5456_p5, %p5455_p4 }
   0xf   :  { %p5458_p7 = pnand %p5457_p6, %p5451_p3 }
  0x11   :  { %5461 = shalt.err (!%p5458_p7)
}
  0x12   :  { %s5537_s27 = smov 256   ;;  %s5538_s28 = smov 16  }
  0x13   :  { %34 = dma.hbm_to_vmem [thread:$0]  %s5892_s1, 28672, %s29_s18, [#allocation3], %s5537_s27, %s5537_s27, %s5538_s28  }
  0x14   :  { %s5539_s12 = smov [#allocation5]   ;;  %s5462_s16 = scalar_lea.hbm %s5899_s8, 28672 }
  0x15   :  { %s52_s13 = sshll.u32 %s5539_s12, 4  ;;  %p5463_p8 = scmp.ne.s32.totalorder %s5899_s8, %s5462_s16  ;;  %s53_s13 = int_to_ptr.vmem [resolvable:$true] %s52_s13 }
  0x16   :  { %p5466_p9 = scmp.lt.u32.totalorder %s5462_s16, %s5899_s8 }
  0x18   :  { %p5468_p10 = pnand %p5466_p9, %p5463_p8 }
  0x1a   :  { %5471 = shalt.err (!%p5468_p10)
}
  0x1b   :  { %s5472_s22 = scalar_lea.vmem %s53_s13, 28672  ;;  %p5477_p12 = scmp.lt.s32.totalorder %s53_s13, %s53_s13 }
  0x1c   :  { %p5473_p11 = scmp.ne.s32.totalorder %s53_s13, %s5472_s22  ;;  %p5478_p13 = scmp.lt.s32.totalorder %s5472_s22, %s5472_s22 }
  0x1e   :  { %p5479_p0 = por %p5478_p13, %p5477_p12 }
  0x20   :  { %p5480_p1 = pnand %p5479_p0, %p5473_p11 }
  0x22   :  { %5483 = shalt.err (!%p5480_p1)
}
  0x23   :  { %s5540_s1 = smov 448   ;;  %s5541_s18 = smov 28  }
  0x24   :  { %58 = dma.hbm_to_vmem [thread:$0]  %s5899_s8, 28672, %s53_s13, [#allocation6], %s5540_s1, %s5540_s1, %s5541_s18  }
  0x25   :  { %5528 = dma.done.wait [#allocation3], 28672  }
  0x26   :  { %5529 = vsyncadd [#allocation3], 4294938624 }
  0x27   :  { %5530 = dma.done.wait [#allocation6], 28672  }
  0x28   :  { %5531 = vsyncadd [#allocation6], 4294938624  ;;  %v5542_v0 = vmov 0   ;;  %v4714_v1 = vld [vmem:[#allocation2 + $0x4] ss:$16 sps:$4 sm:$0xff]   ;;  %s5544_s19 = smov 2  }
  0x29   :  { %1618 = vmatprep.mubr.bf16.mxu1 %v5542_v0  ;;  %4713 = vset.pattern.permute.xlu0 %v5542_v0  ;;  %v4716_v2 = vld [vmem:[#allocation2 + $0x604] ss:$16 sps:$4 sm:$0xff]   ;;  %v4718_v3 = vld [vmem:[#allocation2] ss:$16 sps:$4 sm:$0xff]   ;;  %v4767_v34 = vld [vmem:[#allocation2 + $0xc] ss:$16 sps:$4 sm:$0xff]  }
  0x2a   :  { %1463 = vmatprep.subr.bf16.mxu0 %v4714_v1  ;;  %v4719_v4 = vld [vmem:[#allocation2 + $0x600] ss:$16 sps:$4 sm:$0xff]   ;;  %1586 = vmatprep.subr.bf16.mxu1 %v4716_v2  ;;  %v4720_v5 = vld [vmem:[#allocation2 + $0x24] ss:$16 sps:$4 sm:$0xff]   ;;  %v4764_v35 = vld [vmem:[%s5891_s0 + $0x18] ss:$0 sps:$4 sm:$0xff]  }
  0x2b   :  { %1464 = vmatpush1.bf16.msra.mxu0 %v4718_v3  ;;  %1587 = vmatpush1.bf16.msra.mxu1 %v4719_v4  ;;  %v4722_v6 = vld [vmem:[#allocation2 + $0x624] ss:$16 sps:$4 sm:$0xff]   ;;  %v4724_v7 = vld [vmem:[#allocation2 + $0x20] ss:$16 sps:$4 sm:$0xff]   ;;  %v4765_v36 = vld [vmem:[#allocation2 + $0x8] ss:$16 sps:$4 sm:$0xff]  }
  0x2c   :  { %1465 = vmatprep.subr.bf16.mxu0 %v4720_v5  ;;  %v4725_v8 = vld [vmem:[#allocation2 + $0x620] ss:$16 sps:$4 sm:$0xff]   ;;  %1588 = vmatprep.subr.bf16.mxu1 %v4722_v6  ;;  %v4726_v9 = vld [vmem:[#allocation2 + $0x44] ss:$16 sps:$4 sm:$0xff]   ;;  %v4773_v39 = vld [vmem:[#allocation2 + $0x2c] ss:$16 sps:$4 sm:$0xff]  }
  0x2d   :  { %v4728_v10 = vld [vmem:[#allocation2 + $0x644] ss:$16 sps:$4 sm:$0xff]   ;;  %v4730_v11 = vld [vmem:[#allocation2 + $0x40] ss:$16 sps:$4 sm:$0xff]   ;;  %v4771_v40 = vld [vmem:[#allocation2 + $0x28] ss:$16 sps:$4 sm:$0xff]  }
  0x2e   :  { %v4731_v12 = vld [vmem:[#allocation2 + $0x640] ss:$16 sps:$4 sm:$0xff]   ;;  %v4732_v13 = vld [vmem:[#allocation2 + $0x64] ss:$16 sps:$4 sm:$0xff]   ;;  %v4779_v43 = vld [vmem:[#allocation2 + $0x4c] ss:$16 sps:$4 sm:$0xff]  }
  0x2f   :  { %1466 = vmatpush1.bf16.msra.mxu0 %v4724_v7  ;;  %1589 = vmatpush1.bf16.msra.mxu1 %v4725_v8  ;;  %v4734_v14 = vld [vmem:[#allocation2 + $0x664] ss:$16 sps:$4 sm:$0xff]   ;;  %v4736_v15 = vld [vmem:[#allocation2 + $0x60] ss:$16 sps:$4 sm:$0xff]   ;;  %v4777_v44 = vld [vmem:[#allocation2 + $0x48] ss:$16 sps:$4 sm:$0xff]  }
  0x30   :  { %1467 = vmatprep.subr.bf16.mxu0 %v4726_v9  ;;  %1590 = vmatprep.subr.bf16.mxu1 %v4728_v10  ;;  %v4737_v16 = vld [vmem:[#allocation2 + $0x660] ss:$16 sps:$4 sm:$0xff]   ;;  %v4738_v17 = vld [vmem:[#allocation2 + $0x84] ss:$16 sps:$4 sm:$0xff]   ;;  %v4785_v47 = vld [vmem:[#allocation2 + $0x6c] ss:$16 sps:$4 sm:$0xff]  }
  0x31   :  { %v4740_v18 = vld [vmem:[#allocation2 + $0x684] ss:$16 sps:$4 sm:$0xff]   ;;  %v4742_v19 = vld [vmem:[#allocation2 + $0x80] ss:$16 sps:$4 sm:$0xff]   ;;  %v4783_v48 = vld [vmem:[#allocation2 + $0x68] ss:$16 sps:$4 sm:$0xff]  }
  0x32   :  { %v4743_v20 = vld [vmem:[#allocation2 + $0x680] ss:$16 sps:$4 sm:$0xff]   ;;  %v4744_v21 = vld [vmem:[#allocation2 + $0xa4] ss:$16 sps:$4 sm:$0xff]   ;;  %v4791_v53 = vld [vmem:[#allocation2 + $0x8c] ss:$16 sps:$4 sm:$0xff]  }
  0x33   :  { %1468 = vmatpush1.bf16.msra.mxu0 %v4730_v11  ;;  %1591 = vmatpush1.bf16.msra.mxu1 %v4731_v12  ;;  %v4746_v22 = vld [vmem:[#allocation2 + $0x6a4] ss:$16 sps:$4 sm:$0xff]   ;;  %v4748_v23 = vld [vmem:[#allocation2 + $0xa0] ss:$16 sps:$4 sm:$0xff]   ;;  %v4789_v54 = vld [vmem:[#allocation2 + $0x88] ss:$16 sps:$4 sm:$0xff]  }
  0x34   :  { %1469 = vmatprep.subr.bf16.mxu0 %v4732_v13  ;;  %1592 = vmatprep.subr.bf16.mxu1 %v4734_v14  ;;  %v4749_v24 = vld [vmem:[#allocation2 + $0x6a0] ss:$16 sps:$4 sm:$0xff]   ;;  %v4750_v25 = vld [vmem:[#allocation2 + $0xc4] ss:$16 sps:$4 sm:$0xff]   ;;  %v4797_v57 = vld [vmem:[#allocation2 + $0xac] ss:$16 sps:$4 sm:$0xff]  }
  0x35   :  { %v4752_v26 = vld [vmem:[#allocation2 + $0x6c4] ss:$16 sps:$4 sm:$0xff]   ;;  %v4754_v27 = vld [vmem:[#allocation2 + $0xc0] ss:$16 sps:$4 sm:$0xff]   ;;  %v4795_v58 = vld [vmem:[#allocation2 + $0xa8] ss:$16 sps:$4 sm:$0xff]  }
  0x36   :  { %v4755_v28 = vld [vmem:[#allocation2 + $0x6c0] ss:$16 sps:$4 sm:$0xff]   ;;  %v4756_v29 = vld [vmem:[#allocation2 + $0xe4] ss:$16 sps:$4 sm:$0xff]   ;;  %v4803_v61 = vld [vmem:[#allocation2 + $0xcc] ss:$16 sps:$4 sm:$0xff]  }
  0x37   :  { %1470 = vmatpush1.bf16.msra.mxu0 %v4736_v15  ;;  %1593 = vmatpush1.bf16.msra.mxu1 %v4737_v16  ;;  %v4758_v30 = vld [vmem:[#allocation2 + $0x6e4] ss:$16 sps:$4 sm:$0xff]   ;;  %v4760_v31 = vld [vmem:[#allocation2 + $0xe0] ss:$16 sps:$4 sm:$0xff]   ;;  %v4801_v62 = vld [vmem:[#allocation2 + $0xc8] ss:$16 sps:$4 sm:$0xff]  }
  0x38   :  { %1471 = vmatprep.subr.bf16.mxu0 %v4738_v17  ;;  %1594 = vmatprep.subr.bf16.mxu1 %v4740_v18  ;;  %v4761_v32 = vld [vmem:[#allocation2 + $0x6e0] ss:$16 sps:$4 sm:$0xff]   ;;  %v4762_v33 = vld [vmem:[#allocation2 + $0x104] ss:$16 sps:$4 sm:$0xff]   ;;  %v4809_v2 = vld [vmem:[#allocation2 + $0xec] ss:$16 sps:$4 sm:$0xff]  }
  0x39   :  { %v4768_v37 = vld [vmem:[#allocation2 + $0x100] ss:$16 sps:$4 sm:$0xff]   ;;  %v4769_v38 = vld [vmem:[#allocation2 + $0x124] ss:$16 sps:$4 sm:$0xff]   ;;  %v4807_v3 = vld [vmem:[#allocation2 + $0xe8] ss:$16 sps:$4 sm:$0xff]  }
  0x3a   :  { %v4774_v41 = vld [vmem:[#allocation2 + $0x120] ss:$16 sps:$4 sm:$0xff]   ;;  %v4775_v42 = vld [vmem:[#allocation2 + $0x144] ss:$16 sps:$4 sm:$0xff]   ;;  %v4818_v6 = vld [vmem:[#allocation2 + $0x10c] ss:$16 sps:$4 sm:$0xff]  }
  0x3b   :  { %1472 = vmatpush1.bf16.msra.mxu0 %v4742_v19  ;;  %1595 = vmatpush1.bf16.msra.mxu1 %v4743_v20  ;;  %v4780_v45 = vld [vmem:[#allocation2 + $0x140] ss:$16 sps:$4 sm:$0xff]   ;;  %v4781_v46 = vld [vmem:[#allocation2 + $0x164] ss:$16 sps:$4 sm:$0xff]   ;;  %v4816_v9 = vld [vmem:[#allocation2 + $0x108] ss:$16 sps:$4 sm:$0xff]  }
  0x3c   :  { %1473 = vmatprep.subr.bf16.mxu0 %v4744_v21  ;;  %1596 = vmatprep.subr.bf16.mxu1 %v4746_v22  ;;  %v68_v49 = vld [vmem:[%s5891_s0] sm:$0xff]  ;;  %v4824_v11 = vld [vmem:[#allocation2 + $0x12c] ss:$16 sps:$4 sm:$0xff]   ;;  %v4822_v13 = vld [vmem:[#allocation2 + $0x128] ss:$16 sps:$4 sm:$0xff]   ;;  %vm4040_vm0 = vcmask 15360  }
  0x3d   :  { %v4786_v50 = vld [vmem:[#allocation2 + $0x160] ss:$16 sps:$4 sm:$0xff]   ;;  %v4787_v51 = vld [vmem:[#allocation2 + $0x184] ss:$16 sps:$4 sm:$0xff]   ;;  %v4076_v52 = vcombine.high %v68_v49, %v68_v49  ;;  %v5639_v7 = vcombine.low %v68_v49, %v68_v49  ;;  %v4830_v15 = vld [vmem:[#allocation2 + $0x14c] ss:$16 sps:$4 sm:$0xff]  }
  0x3e   :  { %v4792_v55 = vld [vmem:[#allocation2 + $0x180] ss:$16 sps:$4 sm:$0xff]   ;;  %v4793_v56 = vld [vmem:[#allocation2 + $0x1a4] ss:$16 sps:$4 sm:$0xff]   ;;  %v4828_v17 = vld [vmem:[#allocation2 + $0x148] ss:$16 sps:$4 sm:$0xff]  }
  0x3f   :  { %1474 = vmatpush1.bf16.msra.mxu0 %v4748_v23  ;;  %1597 = vmatpush1.bf16.msra.mxu1 %v4749_v24  ;;  %v4798_v59 = vld [vmem:[#allocation2 + $0x1a0] ss:$16 sps:$4 sm:$0xff]   ;;  %v4799_v60 = vld [vmem:[#allocation2 + $0x1c4] ss:$16 sps:$4 sm:$0xff]   ;;  %v4836_v19 = vld [vmem:[#allocation2 + $0x16c] ss:$16 sps:$4 sm:$0xff]  }
  0x40   :  { %1475 = vmatprep.subr.bf16.mxu0 %v4750_v25  ;;  %1598 = vmatprep.subr.bf16.mxu1 %v4752_v26  ;;  %v4804_v63 = vld [vmem:[#allocation2 + $0x1c0] ss:$16 sps:$4 sm:$0xff]   ;;  %v4805_v1 = vld [vmem:[#allocation2 + $0x1e4] ss:$16 sps:$4 sm:$0xff]   ;;  %v4834_v21 = vld [vmem:[#allocation2 + $0x168] ss:$16 sps:$4 sm:$0xff]  }
  0x41   :  { %1495 = vmatprep.mubr.bf16.mxu0 %v4076_v52  ;;  %v4810_v4 = vld [vmem:[#allocation2 + $0x1e0] ss:$16 sps:$4 sm:$0xff]   ;;  %v4815_v5 = vld [vmem:[#allocation2 + $0x204] ss:$16 sps:$4 sm:$0xff]   ;;  %v4842_v23 = vld [vmem:[#allocation2 + $0x18c] ss:$16 sps:$4 sm:$0xff]  }
  0x42   :  { %v4813_v8 = vld [vmem:[#allocation2 + $0x200] ss:$16 sps:$4 sm:$0xff]   ;;  %v4821_v10 = vld [vmem:[#allocation2 + $0x224] ss:$16 sps:$4 sm:$0xff]   ;;  %v4840_v25 = vld [vmem:[#allocation2 + $0x188] ss:$16 sps:$4 sm:$0xff]  }
  0x43   :  { %1476 = vmatpush1.bf16.msra.mxu0 %v4754_v27  ;;  %1599 = vmatpush1.bf16.msra.mxu1 %v4755_v28  ;;  %v4819_v12 = vld [vmem:[#allocation2 + $0x220] ss:$16 sps:$4 sm:$0xff]   ;;  %v4827_v14 = vld [vmem:[#allocation2 + $0x244] ss:$16 sps:$4 sm:$0xff]   ;;  %v4848_v27 = vld [vmem:[#allocation2 + $0x1ac] ss:$16 sps:$4 sm:$0xff]  }
  0x44   :  { %1477 = vmatprep.subr.bf16.mxu0 %v4756_v29  ;;  %1600 = vmatprep.subr.bf16.mxu1 %v4758_v30  ;;  %v4825_v16 = vld [vmem:[#allocation2 + $0x240] ss:$16 sps:$4 sm:$0xff]   ;;  %v4833_v18 = vld [vmem:[#allocation2 + $0x264] ss:$16 sps:$4 sm:$0xff]   ;;  %v4846_v29 = vld [vmem:[#allocation2 + $0x1a8] ss:$16 sps:$4 sm:$0xff]  }
  0x45   :  { %v4831_v20 = vld [vmem:[#allocation2 + $0x260] ss:$16 sps:$4 sm:$0xff]   ;;  %v4839_v22 = vld [vmem:[#allocation2 + $0x284] ss:$16 sps:$4 sm:$0xff]   ;;  %v4878_v49 = vld [vmem:[#allocation2 + $0x24c] ss:$16 sps:$4 sm:$0xff]  }
  0x46   :  { %v4837_v24 = vld [vmem:[#allocation2 + $0x280] ss:$16 sps:$4 sm:$0xff]   ;;  %v4845_v26 = vld [vmem:[#allocation2 + $0x2a4] ss:$16 sps:$4 sm:$0xff]   ;;  %vm4042_vm1 = vcmask 23552  }
  0x47   :  { %1478 = vmatpush1.bf16.msra.mxu0 %v4760_v31  ;;  %1601 = vmatpush1.bf16.msra.mxu1 %v4761_v32  ;;  %v4843_v28 = vld [vmem:[#allocation2 + $0x2a0] ss:$16 sps:$4 sm:$0xff]   ;;  %v4851_v30 = vld [vmem:[#allocation2 + $0x2c4] ss:$16 sps:$4 sm:$0xff]   ;;  %v4854_v31 = vld [vmem:[#allocation2 + $0x1cc] ss:$16 sps:$4 sm:$0xff]  }
  0x48   :  { %1479 = vmatprep.subr.bf16.mxu0 %v4762_v33  ;;  %1627 = vmatprep.subr.bf16.mxu1 %v4767_v34  ;;  %v5645_v32 = vld [vmem:[%s5891_s0 + $0x8] sm:$0xff]  ;;  %v4849_v33 = vld [vmem:[#allocation2 + $0x2c0] ss:$16 sps:$4 sm:$0xff]  }
  0x49   :  { %v4852_v34 = vld [vmem:[#allocation2 + $0x1c8] ss:$16 sps:$4 sm:$0xff]  }
  0x4a   :  { %1619 = vmatmul.mubr.bf16.vlgmr.msra.gmra.mrb[0].mxu1 %v4764_v35  ;;  %v4078_v35 = vcombine.high %v5645_v32, %v5645_v32 }
  0x4b   :  { %1480 = vmatpush1.bf16.msra.mxu0 %v4768_v37  ;;  %1628 = vmatpush1.bf16.msra.mxu1 %v4765_v36  ;;  %v4857_v36 = vld [vmem:[#allocation2 + $0x2e4] ss:$16 sps:$4 sm:$0xff]   ;;  %v4860_v37 = vld [vmem:[#allocation2 + $0x1ec] ss:$16 sps:$4 sm:$0xff]  }
  0x4c   :  { %1481 = vmatprep.subr.bf16.mxu0 %v4769_v38  ;;  %1629 = vmatprep.subr.bf16.mxu1 %v4773_v39  ;;  %v4855_v38 = vld [vmem:[#allocation2 + $0x2e0] ss:$16 sps:$4 sm:$0xff]   ;;  %v4858_v39 = vld [vmem:[#allocation2 + $0x1e8] ss:$16 sps:$4 sm:$0xff]  }
  0x4d   :  { %1659 = vmatprep.mubr.bf16.mxu1 %v4076_v52  ;;  %v4881_v52 = vld [vmem:[#allocation2 + $0x364] ss:$16 sps:$4 sm:$0xff]  }
  0x4f   :  { %1482 = vmatpush1.bf16.msra.mxu0 %v4774_v41  ;;  %1630 = vmatpush1.bf16.msra.mxu1 %v4771_v40  ;;  %v4863_v40 = vld [vmem:[#allocation2 + $0x304] ss:$16 sps:$4 sm:$0xff]   ;;  %v4866_v41 = vld [vmem:[#allocation2 + $0x20c] ss:$16 sps:$4 sm:$0xff]  }
  0x50   :  { %1483 = vmatprep.subr.bf16.mxu0 %v4775_v42  ;;  %1631 = vmatprep.subr.bf16.mxu1 %v4779_v43  ;;  %v4861_v42 = vld [vmem:[#allocation2 + $0x300] ss:$16 sps:$4 sm:$0xff]   ;;  %v4864_v43 = vld [vmem:[#allocation2 + $0x208] ss:$16 sps:$4 sm:$0xff]  }
  0x53   :  { %1484 = vmatpush1.bf16.msra.mxu0 %v4780_v45  ;;  %1632 = vmatpush1.bf16.msra.mxu1 %v4777_v44  ;;  %v4869_v44 = vld [vmem:[#allocation2 + $0x324] ss:$16 sps:$4 sm:$0xff]   ;;  %v4872_v45 = vld [vmem:[#allocation2 + $0x22c] ss:$16 sps:$4 sm:$0xff]  }
  0x54   :  { %1485 = vmatprep.subr.bf16.mxu0 %v4781_v46  ;;  %1633 = vmatprep.subr.bf16.mxu1 %v4785_v47  ;;  %v4867_v46 = vld [vmem:[#allocation2 + $0x320] ss:$16 sps:$4 sm:$0xff]   ;;  %v4870_v47 = vld [vmem:[#allocation2 + $0x228] ss:$16 sps:$4 sm:$0xff]  }
  0x57   :  { %1486 = vmatpush1.bf16.msra.mxu0 %v4786_v50  ;;  %1634 = vmatpush1.bf16.msra.mxu1 %v4783_v48  ;;  %v4875_v48 = vld [vmem:[#allocation2 + $0x344] ss:$16 sps:$4 sm:$0xff]   ;;  %v4873_v50 = vld [vmem:[#allocation2 + $0x340] ss:$16 sps:$4 sm:$0xff]  }
  0x58   :  { %1487 = vmatprep.subr.bf16.mxu0 %v4787_v51  ;;  %1635 = vmatprep.subr.bf16.mxu1 %v4791_v53  ;;  %v4876_v51 = vld [vmem:[#allocation2 + $0x248] ss:$16 sps:$4 sm:$0xff]   ;;  %v4884_v53 = vld [vmem:[#allocation2 + $0x26c] ss:$16 sps:$4 sm:$0xff]  }
  0x5b   :  { %1488 = vmatpush1.bf16.msra.mxu0 %v4792_v55  ;;  %1636 = vmatpush1.bf16.msra.mxu1 %v4789_v54  ;;  %v4879_v54 = vld [vmem:[#allocation2 + $0x360] ss:$16 sps:$4 sm:$0xff]   ;;  %v4882_v55 = vld [vmem:[#allocation2 + $0x268] ss:$16 sps:$4 sm:$0xff]  }
  0x5c   :  { %1489 = vmatprep.subr.bf16.mxu0 %v4793_v56  ;;  %1637 = vmatprep.subr.bf16.mxu1 %v4797_v57  ;;  %v4887_v56 = vld [vmem:[#allocation2 + $0x384] ss:$16 sps:$4 sm:$0xff]   ;;  %v4890_v57 = vld [vmem:[#allocation2 + $0x28c] ss:$16 sps:$4 sm:$0xff]  }
  0x5f   :  { %1490 = vmatpush1.bf16.msra.mxu0 %v4798_v59  ;;  %1638 = vmatpush1.bf16.msra.mxu1 %v4795_v58  ;;  %v4885_v58 = vld [vmem:[#allocation2 + $0x380] ss:$16 sps:$4 sm:$0xff]   ;;  %v4888_v59 = vld [vmem:[#allocation2 + $0x288] ss:$16 sps:$4 sm:$0xff]  }
  0x60   :  { %1491 = vmatprep.subr.bf16.mxu0 %v4799_v60  ;;  %1639 = vmatprep.subr.bf16.mxu1 %v4803_v61  ;;  %v4893_v60 = vld [vmem:[#allocation2 + $0x3a4] ss:$16 sps:$4 sm:$0xff]   ;;  %v4896_v61 = vld [vmem:[#allocation2 + $0x2ac] ss:$16 sps:$4 sm:$0xff]  }
  0x63   :  { %1492 = vmatpush1.bf16.msra.mxu0 %v4804_v63  ;;  %1640 = vmatpush1.bf16.msra.mxu1 %v4801_v62  ;;  %v4891_v62 = vld [vmem:[#allocation2 + $0x3a0] ss:$16 sps:$4 sm:$0xff]   ;;  %v4894_v63 = vld [vmem:[#allocation2 + $0x2a8] ss:$16 sps:$4 sm:$0xff]  }
  0x64   :  { %1493 = vmatprep.subr.bf16.mxu0 %v4805_v1  ;;  %1641 = vmatprep.subr.bf16.mxu1 %v4809_v2  ;;  %v4899_v1 = vld [vmem:[#allocation2 + $0x3c4] ss:$16 sps:$4 sm:$0xff]   ;;  %v4902_v2 = vld [vmem:[#allocation2 + $0x2cc] ss:$16 sps:$4 sm:$0xff]  }
  0x67   :  { %1494 = vmatpush1.bf16.msra.mxu0 %v4810_v4  ;;  %1642 = vmatpush1.bf16.msra.mxu1 %v4807_v3  ;;  %v4897_v3 = vld [vmem:[#allocation2 + $0x3c0] ss:$16 sps:$4 sm:$0xff]   ;;  %v4900_v4 = vld [vmem:[#allocation2 + $0x2c8] ss:$16 sps:$4 sm:$0xff]  }
  0x68   :  { %1504 = vmatprep.subr.bf16.mxu0 %v4815_v5  ;;  %1643 = vmatprep.subr.bf16.mxu1 %v4818_v6  ;;  %v4905_v5 = vld [vmem:[#allocation2 + $0x3e4] ss:$16 sps:$4 sm:$0xff]   ;;  %v4908_v6 = vld [vmem:[#allocation2 + $0x2ec] ss:$16 sps:$4 sm:$0xff]  }
  0x6a   :  { %1496 = vmatmul.mubr.bf16.vlgmr.msra.gmra.mrb[0].mxu0 %v5639_v7 }
  0x6b   :  { %1505 = vmatpush1.bf16.msra.mxu0 %v4813_v8  ;;  %1644 = vmatpush1.bf16.msra.mxu1 %v4816_v9  ;;  %v4906_v8 = vld [vmem:[#allocation2 + $0x2e8] ss:$16 sps:$4 sm:$0xff]   ;;  %v4913_v9 = vld [vmem:[#allocation2 + $0x404] ss:$16 sps:$4 sm:$0xff]  }
  0x6c   :  { %1506 = vmatprep.subr.bf16.mxu0 %v4821_v10  ;;  %1645 = vmatprep.subr.bf16.mxu1 %v4824_v11  ;;  %v4916_v10 = vld [vmem:[#allocation2 + $0x30c] ss:$16 sps:$4 sm:$0xff]   ;;  %v5652_v11 = vcombine.low %v5645_v32, %v5645_v32  ;;  %v4943_v32 = vld [vmem:[#allocation2 + $0x4a4] ss:$16 sps:$4 sm:$0xff]  }
  0x6d   :  { %1536 = vmatprep.mubr.bf16.mxu0 %v4078_v35 }
  0x6f   :  { %1507 = vmatpush1.bf16.msra.mxu0 %v4819_v12  ;;  %1646 = vmatpush1.bf16.msra.mxu1 %v4822_v13  ;;  %v4911_v12 = vld [vmem:[#allocation2 + $0x400] ss:$16 sps:$4 sm:$0xff]   ;;  %v4914_v13 = vld [vmem:[#allocation2 + $0x308] ss:$16 sps:$4 sm:$0xff]  }
  0x70   :  { %1508 = vmatprep.subr.bf16.mxu0 %v4827_v14  ;;  %1647 = vmatprep.subr.bf16.mxu1 %v4830_v15  ;;  %v4919_v14 = vld [vmem:[#allocation2 + $0x424] ss:$16 sps:$4 sm:$0xff]   ;;  %v4922_v15 = vld [vmem:[#allocation2 + $0x32c] ss:$16 sps:$4 sm:$0xff]  }
  0x73   :  { %1509 = vmatpush1.bf16.msra.mxu0 %v4825_v16  ;;  %1648 = vmatpush1.bf16.msra.mxu1 %v4828_v17  ;;  %v5657_v16 = vld [vmem:[%s5891_s0 + $0x10] sm:$0xff] }
  0x74   :  { %1510 = vmatprep.subr.bf16.mxu0 %v4833_v18  ;;  %1649 = vmatprep.subr.bf16.mxu1 %v4836_v19  ;;  %v5661_v17 = vcombine.high %v5657_v16, %v5657_v16  ;;  %v4917_v18 = vld [vmem:[#allocation2 + $0x420] ss:$16 sps:$4 sm:$0xff]   ;;  %v4920_v19 = vld [vmem:[#allocation2 + $0x328] ss:$16 sps:$4 sm:$0xff]  }
  0x77   :  { %1511 = vmatpush1.bf16.msra.mxu0 %v4831_v20  ;;  %1650 = vmatpush1.bf16.msra.mxu1 %v4834_v21  ;;  %v4925_v20 = vld [vmem:[#allocation2 + $0x444] ss:$16 sps:$4 sm:$0xff]   ;;  %v4928_v21 = vld [vmem:[#allocation2 + $0x34c] ss:$16 sps:$4 sm:$0xff]  }
  0x78   :  { %1512 = vmatprep.subr.bf16.mxu0 %v4839_v22  ;;  %1651 = vmatprep.subr.bf16.mxu1 %v4842_v23  ;;  %v4923_v22 = vld [vmem:[#allocation2 + $0x440] ss:$16 sps:$4 sm:$0xff]   ;;  %v4926_v23 = vld [vmem:[#allocation2 + $0x348] ss:$16 sps:$4 sm:$0xff]  }
  0x7b   :  { %1513 = vmatpush1.bf16.msra.mxu0 %v4837_v24  ;;  %1652 = vmatpush1.bf16.msra.mxu1 %v4840_v25  ;;  %v4931_v24 = vld [vmem:[#allocation2 + $0x464] ss:$16 sps:$4 sm:$0xff]   ;;  %v4934_v25 = vld [vmem:[#allocation2 + $0x36c] ss:$16 sps:$4 sm:$0xff]  }
  0x7c   :  { %1514 = vmatprep.subr.bf16.mxu0 %v4845_v26  ;;  %1653 = vmatprep.subr.bf16.mxu1 %v4848_v27  ;;  %v4929_v26 = vld [vmem:[#allocation2 + $0x460] ss:$16 sps:$4 sm:$0xff]   ;;  %v4932_v27 = vld [vmem:[#allocation2 + $0x368] ss:$16 sps:$4 sm:$0xff]  }
  0x7f   :  { %1515 = vmatpush1.bf16.msra.mxu0 %v4843_v28  ;;  %1654 = vmatpush1.bf16.msra.mxu1 %v4846_v29  ;;  %v4937_v28 = vld [vmem:[#allocation2 + $0x484] ss:$16 sps:$4 sm:$0xff]   ;;  %v4940_v29 = vld [vmem:[#allocation2 + $0x38c] ss:$16 sps:$4 sm:$0xff]  }
  0x80   :  { %1516 = vmatprep.subr.bf16.mxu0 %v4851_v30  ;;  %1655 = vmatprep.subr.bf16.mxu1 %v4854_v31  ;;  %v4935_v30 = vld [vmem:[#allocation2 + $0x480] ss:$16 sps:$4 sm:$0xff]   ;;  %v4938_v31 = vld [vmem:[#allocation2 + $0x388] ss:$16 sps:$4 sm:$0xff]  }
  0x83   :  { %1517 = vmatpush1.bf16.msra.mxu0 %v4849_v33  ;;  %1656 = vmatpush1.bf16.msra.mxu1 %v4852_v34  ;;  %v4946_v33 = vld [vmem:[#allocation2 + $0x3ac] ss:$16 sps:$4 sm:$0xff]   ;;  %v4941_v34 = vld [vmem:[#allocation2 + $0x4a0] ss:$16 sps:$4 sm:$0xff]  }
  0x84   :  { %1518 = vmatprep.subr.bf16.mxu0 %v4857_v36  ;;  %1657 = vmatprep.subr.bf16.mxu1 %v4860_v37  ;;  %v4949_v36 = vld [vmem:[#allocation2 + $0x4c4] ss:$16 sps:$4 sm:$0xff]   ;;  %v4952_v37 = vld [vmem:[#allocation2 + $0x3cc] ss:$16 sps:$4 sm:$0xff]  }
  0x87   :  { %1519 = vmatpush1.bf16.msra.mxu0 %v4855_v38  ;;  %1658 = vmatpush1.bf16.msra.mxu1 %v4858_v39  ;;  %v4947_v38 = vld [vmem:[#allocation2 + $0x4c0] ss:$16 sps:$4 sm:$0xff]   ;;  %v4950_v39 = vld [vmem:[#allocation2 + $0x3c8] ss:$16 sps:$4 sm:$0xff]  }
  0x88   :  { %1520 = vmatprep.subr.bf16.mxu0 %v4863_v40  ;;  %1668 = vmatprep.subr.bf16.mxu1 %v4866_v41  ;;  %v4955_v40 = vld [vmem:[#allocation2 + $0x4e4] ss:$16 sps:$4 sm:$0xff]   ;;  %v4958_v41 = vld [vmem:[#allocation2 + $0x3ec] ss:$16 sps:$4 sm:$0xff]  }
  0x8a   :  { %1660 = vmatmul.mubr.bf16.vlgmr.msra.gmra.mrb[4].mxu1 %v5639_v7  ;;  %v4903_v7 = vld [vmem:[#allocation2 + $0x3e0] ss:$16 sps:$4 sm:$0xff]  }
  0x8b   :  { %1521 = vmatpush1.bf16.msra.mxu0 %v4861_v42  ;;  %1669 = vmatpush1.bf16.msra.mxu1 %v4864_v43  ;;  %v4953_v42 = vld [vmem:[#allocation2 + $0x4e0] ss:$16 sps:$4 sm:$0xff]   ;;  %v4956_v43 = vld [vmem:[#allocation2 + $0x3e8] ss:$16 sps:$4 sm:$0xff]  }
  0x8c   :  { %1522 = vmatprep.subr.bf16.mxu0 %v4869_v44  ;;  %1670 = vmatprep.subr.bf16.mxu1 %v4872_v45  ;;  %v4961_v44 = vld [vmem:[#allocation2 + $0x504] ss:$16 sps:$4 sm:$0xff]   ;;  %v4964_v45 = vld [vmem:[#allocation2 + $0x40c] ss:$16 sps:$4 sm:$0xff]  }
  0x8d   :  { %1700 = vmatprep.mubr.bf16.mxu1 %v4078_v35  ;;  %v4944_v35 = vld [vmem:[#allocation2 + $0x3a8] ss:$16 sps:$4 sm:$0xff]  }
  0x8f   :  { %1523 = vmatpush1.bf16.msra.mxu0 %v4867_v46  ;;  %1671 = vmatpush1.bf16.msra.mxu1 %v4870_v47  ;;  %v4959_v46 = vld [vmem:[#allocation2 + $0x500] ss:$16 sps:$4 sm:$0xff]   ;;  %v4962_v47 = vld [vmem:[#allocation2 + $0x408] ss:$16 sps:$4 sm:$0xff]  }
  0x90   :  { %1524 = vmatprep.subr.bf16.mxu0 %v4875_v48  ;;  %1672 = vmatprep.subr.bf16.mxu1 %v4878_v49  ;;  %v4967_v48 = vld [vmem:[#allocation2 + $0x524] ss:$16 sps:$4 sm:$0xff]   ;;  %v4970_v49 = vld [vmem:[#allocation2 + $0x42c] ss:$16 sps:$4 sm:$0xff]  }
  0x93   :  { %1525 = vmatpush1.bf16.msra.mxu0 %v4873_v50  ;;  %1673 = vmatpush1.bf16.msra.mxu1 %v4876_v51  ;;  %v4965_v50 = vld [vmem:[#allocation2 + $0x520] ss:$16 sps:$4 sm:$0xff]   ;;  %v4968_v51 = vld [vmem:[#allocation2 + $0x428] ss:$16 sps:$4 sm:$0xff]  }
  0x94   :  { %1526 = vmatprep.subr.bf16.mxu0 %v4881_v52  ;;  %1674 = vmatprep.subr.bf16.mxu1 %v4884_v53  ;;  %v4973_v52 = vld [vmem:[#allocation2 + $0x544] ss:$16 sps:$4 sm:$0xff]   ;;  %v4976_v53 = vld [vmem:[#allocation2 + $0x44c] ss:$16 sps:$4 sm:$0xff]  }
  0x97   :  { %1527 = vmatpush1.bf16.msra.mxu0 %v4879_v54  ;;  %1675 = vmatpush1.bf16.msra.mxu1 %v4882_v55  ;;  %v4971_v54 = vld [vmem:[#allocation2 + $0x540] ss:$16 sps:$4 sm:$0xff]   ;;  %v4974_v55 = vld [vmem:[#allocation2 + $0x448] ss:$16 sps:$4 sm:$0xff]  }
  0x98   :  { %1528 = vmatprep.subr.bf16.mxu0 %v4887_v56  ;;  %1676 = vmatprep.subr.bf16.mxu1 %v4890_v57  ;;  %v4979_v56 = vld [vmem:[#allocation2 + $0x564] ss:$16 sps:$4 sm:$0xff]   ;;  %v4982_v57 = vld [vmem:[#allocation2 + $0x46c] ss:$16 sps:$4 sm:$0xff]  }
  0x9b   :  { %1529 = vmatpush1.bf16.msra.mxu0 %v4885_v58  ;;  %1677 = vmatpush1.bf16.msra.mxu1 %v4888_v59  ;;  %v4977_v58 = vld [vmem:[#allocation2 + $0x560] ss:$16 sps:$4 sm:$0xff]   ;;  %v4980_v59 = vld [vmem:[#allocation2 + $0x468] ss:$16 sps:$4 sm:$0xff]  }
  0x9c   :  { %1530 = vmatprep.subr.bf16.mxu0 %v4893_v60  ;;  %1678 = vmatprep.subr.bf16.mxu1 %v4896_v61  ;;  %v4985_v60 = vld [vmem:[#allocation2 + $0x584] ss:$16 sps:$4 sm:$0xff]   ;;  %v4988_v61 = vld [vmem:[#allocation2 + $0x48c] ss:$16 sps:$4 sm:$0xff]  }
  0x9f   :  { %1531 = vmatpush1.bf16.msra.mxu0 %v4891_v62  ;;  %1679 = vmatpush1.bf16.msra.mxu1 %v4894_v63  ;;  %v4983_v62 = vld [vmem:[#allocation2 + $0x580] ss:$16 sps:$4 sm:$0xff]   ;;  %v4986_v63 = vld [vmem:[#allocation2 + $0x488] ss:$16 sps:$4 sm:$0xff]  }
  0xa0   :  { %1532 = vmatprep.subr.bf16.mxu0 %v4899_v1  ;;  %1680 = vmatprep.subr.bf16.mxu1 %v4902_v2  ;;  %v4991_v1 = vld [vmem:[#allocation2 + $0x5a4] ss:$16 sps:$4 sm:$0xff]   ;;  %v4994_v2 = vld [vmem:[#allocation2 + $0x4ac] ss:$16 sps:$4 sm:$0xff]  }
  0xa3   :  { %1533 = vmatpush1.bf16.msra.mxu0 %v4897_v3  ;;  %1681 = vmatpush1.bf16.msra.mxu1 %v4900_v4  ;;  %v4989_v3 = vld [vmem:[#allocation2 + $0x5a0] ss:$16 sps:$4 sm:$0xff]   ;;  %v4992_v4 = vld [vmem:[#allocation2 + $0x4a8] ss:$16 sps:$4 sm:$0xff]  }
  0xa4   :  { %1534 = vmatprep.subr.bf16.mxu0 %v4905_v5  ;;  %1682 = vmatprep.subr.bf16.mxu1 %v4908_v6  ;;  %v4997_v5 = vld [vmem:[#allocation2 + $0x5c4] ss:$16 sps:$4 sm:$0xff]   ;;  %v5000_v6 = vld [vmem:[#allocation2 + $0x4cc] ss:$16 sps:$4 sm:$0xff]  }
  0xa7   :  { %1535 = vmatpush1.bf16.msra.mxu0 %v4903_v7  ;;  %1683 = vmatpush1.bf16.msra.mxu1 %v4906_v8  ;;  %v4995_v7 = vld [vmem:[#allocation2 + $0x5c0] ss:$16 sps:$4 sm:$0xff]   ;;  %v4998_v8 = vld [vmem:[#allocation2 + $0x4c8] ss:$16 sps:$4 sm:$0xff]  }
  0xa8   :  { %1545 = vmatprep.subr.bf16.mxu0 %v4913_v9  ;;  %1684 = vmatprep.subr.bf16.mxu1 %v4916_v10  ;;  %v5003_v9 = vld [vmem:[#allocation2 + $0x5e4] ss:$16 sps:$4 sm:$0xff]   ;;  %v5006_v10 = vld [vmem:[#allocation2 + $0x4ec] ss:$16 sps:$4 sm:$0xff]  }
  0xaa   :  { %1537 = vmatmul.mubr.bf16.vlgmr.msra.gmra.mrb[0].mxu0 %v5652_v11 }
  0xab   :  { %1546 = vmatpush1.bf16.msra.mxu0 %v4911_v12  ;;  %1685 = vmatpush1.bf16.msra.mxu1 %v4914_v13  ;;  %v5004_v12 = vld [vmem:[#allocation2 + $0x4e8] ss:$16 sps:$4 sm:$0xff]   ;;  %v5011_v13 = vld [vmem:[#allocation2 + $0x50c] ss:$16 sps:$4 sm:$0xff]  }
  0xac   :  { %1547 = vmatprep.subr.bf16.mxu0 %v4919_v14  ;;  %1686 = vmatprep.subr.bf16.mxu1 %v4922_v15  ;;  %v5057_v14 = vld [vmem:[%s5894_s3 + $0x40] sm:$0xff]   ;;  %v5009_v15 = vld [vmem:[#allocation2 + $0x508] ss:$16 sps:$4 sm:$0xff]  }
  0xad   :  { %1577 = vmatprep.mubr.bf16.mxu0 %v5661_v17 }
  0xaf   :  { %1548 = vmatpush1.bf16.msra.mxu0 %v4917_v18  ;;  %1687 = vmatpush1.bf16.msra.mxu1 %v4920_v19  ;;  %v4079_v18 = vcombine.low %v5657_v16, %v5657_v16  ;;  %v5014_v19 = vld [vmem:[#allocation2 + $0x52c] ss:$16 sps:$4 sm:$0xff]   ;;  %v5061_v16 = vld [vmem:[%s5894_s3 + $0x50] sm:$0xff]  }
  0xb0   :  { %1549 = vmatprep.subr.bf16.mxu0 %v4925_v20  ;;  %1688 = vmatprep.subr.bf16.mxu1 %v4928_v21  ;;  %v5059_v20 = vld [vmem:[%s5894_s3 + $0x48] sm:$0xff]  }
  0xb1   :  { %v5012_v21 = vld [vmem:[#allocation2 + $0x528] ss:$16 sps:$4 sm:$0xff]  }
  0xb3   :  { %1550 = vmatpush1.bf16.msra.mxu0 %v4923_v22  ;;  %1689 = vmatpush1.bf16.msra.mxu1 %v4926_v23  ;;  %v5060_v22 = vld [vmem:[%s5894_s3 + $0x8] sm:$0xff]  }
  0xb4   :  { %1551 = vmatprep.subr.bf16.mxu0 %v4931_v24  ;;  %1690 = vmatprep.subr.bf16.mxu1 %v4934_v25  ;;  %v5017_v23 = vld [vmem:[#allocation2 + $0x54c] ss:$16 sps:$4 sm:$0xff]   ;;  %v5015_v24 = vld [vmem:[#allocation2 + $0x548] ss:$16 sps:$4 sm:$0xff]   ;;  %v5062_v25 = vld [vmem:[%s5894_s3 + $0x10] sm:$0xff]  }
  0xb7   :  { %1552 = vmatpush1.bf16.msra.mxu0 %v4929_v26  ;;  %1691 = vmatpush1.bf16.msra.mxu1 %v4932_v27  ;;  %v5020_v26 = vld [vmem:[#allocation2 + $0x56c] ss:$16 sps:$4 sm:$0xff]  }
  0xb8   :  { %1553 = vmatprep.subr.bf16.mxu0 %v4937_v28  ;;  %1692 = vmatprep.subr.bf16.mxu1 %v4940_v29  ;;  %v5063_v27 = vld [vmem:[%s5894_s3 + $0x58] sm:$0xff]  }
  0xb9   :  { %v5018_v28 = vld [vmem:[#allocation2 + $0x568] ss:$16 sps:$4 sm:$0xff]  }
  0xba   :  { %v5064_v29 = vld [vmem:[%s5894_s3 + $0x18] sm:$0xff]  }
  0xbb   :  { %1554 = vmatpush1.bf16.msra.mxu0 %v4935_v30  ;;  %1693 = vmatpush1.bf16.msra.mxu1 %v4938_v31  ;;  %v5023_v30 = vld [vmem:[#allocation2 + $0x58c] ss:$16 sps:$4 sm:$0xff]   ;;  %v5065_v31 = vld [vmem:[%s5894_s3 + $0x60] sm:$0xff]  }
  0xbc   :  { %1555 = vmatprep.subr.bf16.mxu0 %v4943_v32  ;;  %1694 = vmatprep.subr.bf16.mxu1 %v4946_v33  ;;  %v5021_v32 = vld [vmem:[#allocation2 + $0x588] ss:$16 sps:$4 sm:$0xff]   ;;  %v5066_v33 = vld [vmem:[%s5894_s3 + $0x20] sm:$0xff]  }
  0xbf   :  { %1556 = vmatpush1.bf16.msra.mxu0 %v4941_v34  ;;  %1695 = vmatpush1.bf16.msra.mxu1 %v4944_v35  ;;  %v5026_v34 = vld [vmem:[#allocation2 + $0x5ac] ss:$16 sps:$4 sm:$0xff]  }
  0xc0   :  { %1557 = vmatprep.subr.bf16.mxu0 %v4949_v36  ;;  %1696 = vmatprep.subr.bf16.mxu1 %v4952_v37  ;;  %v5067_v35 = vld [vmem:[%s5894_s3 + $0x68] sm:$0xff]  }
  0xc1   :  { %v5024_v36 = vld [vmem:[#allocation2 + $0x5a8] ss:$16 sps:$4 sm:$0xff]   ;;  %v5029_v37 = vld [vmem:[#allocation2 + $0x5cc] ss:$16 sps:$4 sm:$0xff]  }
  0xc3   :  { %1558 = vmatpush1.bf16.msra.mxu0 %v4947_v38  ;;  %1697 = vmatpush1.bf16.msra.mxu1 %v4950_v39  ;;  %v5027_v38 = vld [vmem:[#allocation2 + $0x5c8] ss:$16 sps:$4 sm:$0xff]   ;;  %v5032_v39 = vld [vmem:[#allocation2 + $0x5ec] ss:$16 sps:$4 sm:$0xff]  }
  0xc4   :  { %1559 = vmatprep.subr.bf16.mxu0 %v4955_v40  ;;  %1698 = vmatprep.subr.bf16.mxu1 %v4958_v41  ;;  %v5030_v40 = vld [vmem:[#allocation2 + $0x5e8] ss:$16 sps:$4 sm:$0xff]   ;;  %v5035_v41 = vld [vmem:[#allocation2 + $0x60c] ss:$16 sps:$4 sm:$0xff]  }
  0xc7   :  { %1560 = vmatpush1.bf16.msra.mxu0 %v4953_v42  ;;  %1699 = vmatpush1.bf16.msra.mxu1 %v4956_v43  ;;  %v5033_v42 = vld [vmem:[#allocation2 + $0x608] ss:$16 sps:$4 sm:$0xff]   ;;  %v5038_v43 = vld [vmem:[#allocation2 + $0x62c] ss:$16 sps:$4 sm:$0xff]  }
  0xc8   :  { %1561 = vmatprep.subr.bf16.mxu0 %v4961_v44  ;;  %1709 = vmatprep.subr.bf16.mxu1 %v4964_v45  ;;  %v5036_v44 = vld [vmem:[#allocation2 + $0x628] ss:$16 sps:$4 sm:$0xff]   ;;  %v5041_v45 = vld [vmem:[#allocation2 + $0x64c] ss:$16 sps:$4 sm:$0xff]  }
  0xca   :  { %1701 = vmatmul.mubr.bf16.vlgmr.msra.gmra.mrb[4].mxu1 %v5652_v11  ;;  %v5001_v11 = vld [vmem:[#allocation2 + $0x5e0] ss:$16 sps:$4 sm:$0xff]  }
  0xcb   :  { %1562 = vmatpush1.bf16.msra.mxu0 %v4959_v46  ;;  %1710 = vmatpush1.bf16.msra.mxu1 %v4962_v47  ;;  %v5039_v46 = vld [vmem:[#allocation2 + $0x648] ss:$16 sps:$4 sm:$0xff]   ;;  %v5044_v47 = vld [vmem:[#allocation2 + $0x66c] ss:$16 sps:$4 sm:$0xff]  }
  0xcc   :  { %1563 = vmatprep.subr.bf16.mxu0 %v4967_v48  ;;  %1711 = vmatprep.subr.bf16.mxu1 %v4970_v49  ;;  %v5042_v48 = vld [vmem:[#allocation2 + $0x668] ss:$16 sps:$4 sm:$0xff]   ;;  %v5047_v49 = vld [vmem:[#allocation2 + $0x68c] ss:$16 sps:$4 sm:$0xff]  }
  0xcd   :  { %1741 = vmatprep.mubr.bf16.mxu1 %v5661_v17  ;;  %v5058_v17 = vld [vmem:[%s5894_s3] sm:$0xff]  }
  0xcf   :  { %1564 = vmatpush1.bf16.msra.mxu0 %v4965_v50  ;;  %1712 = vmatpush1.bf16.msra.mxu1 %v4968_v51  ;;  %v5045_v50 = vld [vmem:[#allocation2 + $0x688] ss:$16 sps:$4 sm:$0xff]   ;;  %v5050_v51 = vld [vmem:[#allocation2 + $0x6ac] ss:$16 sps:$4 sm:$0xff]  }
  0xd0   :  { %1565 = vmatprep.subr.bf16.mxu0 %v4973_v52  ;;  %1713 = vmatprep.subr.bf16.mxu1 %v4976_v53  ;;  %v5048_v52 = vld [vmem:[#allocation2 + $0x6a8] ss:$16 sps:$4 sm:$0xff]   ;;  %v5053_v53 = vld [vmem:[#allocation2 + $0x6cc] ss:$16 sps:$4 sm:$0xff]  }
  0xd3   :  { %1566 = vmatpush1.bf16.msra.mxu0 %v4971_v54  ;;  %1714 = vmatpush1.bf16.msra.mxu1 %v4974_v55 }
  0xd4   :  { %1567 = vmatprep.subr.bf16.mxu0 %v4979_v56  ;;  %1715 = vmatprep.subr.bf16.mxu1 %v4982_v57  ;;  %v5056_v56 = vld [vmem:[#allocation2 + $0x6ec] ss:$16 sps:$4 sm:$0xff]  }
  0xd7   :  { %1568 = vmatpush1.bf16.msra.mxu0 %v4977_v58  ;;  %1716 = vmatpush1.bf16.msra.mxu1 %v4980_v59  ;;  %v5054_v59 = vld [vmem:[#allocation2 + $0x6e8] ss:$16 sps:$4 sm:$0xff]  }
  0xd8   :  { %1569 = vmatprep.subr.bf16.mxu0 %v4985_v60  ;;  %1717 = vmatprep.subr.bf16.mxu1 %v4988_v61  ;;  %v5439_v60 = vld [vmem:[%s5891_s0 + $0x18] ss:$0 sps:$4 sm:$0xff]   ;;  %v5068_v61 = vld [vmem:[%s5894_s3 + $0x28] sm:$0xff]  }
  0xdb   :  { %1570 = vmatpush1.bf16.msra.mxu0 %v4983_v62  ;;  %1718 = vmatpush1.bf16.msra.mxu1 %v4986_v63  ;;  %v5069_v62 = vld [vmem:[%s5894_s3 + $0x70] sm:$0xff]  }
  0xdc   :  { %1571 = vmatprep.subr.bf16.mxu0 %v4991_v1  ;;  %1719 = vmatprep.subr.bf16.mxu1 %v4994_v2  ;;  %v5070_v63 = vld [vmem:[%s5894_s3 + $0x30] sm:$0xff]   ;;  %v5071_v1 = vld [vmem:[%s5894_s3 + $0x78] sm:$0xff]  }
  0xdd   :  { %v5072_v2 = vld [vmem:[%s5894_s3 + $0x38] sm:$0xff]  }
  0xdf   :  { %1572 = vmatpush1.bf16.msra.mxu0 %v4989_v3  ;;  %1720 = vmatpush1.bf16.msra.mxu1 %v4992_v4  ;;  %v5073_v3 = vld [vmem:[%s5894_s3 + $0xc0] sm:$0xff]  }
  0xe0   :  { %1573 = vmatprep.subr.bf16.mxu0 %v4997_v5  ;;  %1721 = vmatprep.subr.bf16.mxu1 %v5000_v6  ;;  %v5074_v4 = vld [vmem:[%s5894_s3 + $0x80] sm:$0xff]   ;;  %v5075_v5 = vld [vmem:[%s5894_s3 + $0xc8] sm:$0xff]  }
  0xe1   :  { %v5076_v6 = vld [vmem:[%s5894_s3 + $0x88] sm:$0xff]  }
  0xe3   :  { %1574 = vmatpush1.bf16.msra.mxu0 %v4995_v7  ;;  %1722 = vmatpush1.bf16.msra.mxu1 %v4998_v8  ;;  %v5077_v7 = vld [vmem:[%s5894_s3 + $0xd0] sm:$0xff]  }
  0xe4   :  { %1575 = vmatprep.subr.bf16.mxu0 %v5003_v9  ;;  %1723 = vmatprep.subr.bf16.mxu1 %v5006_v10  ;;  %v5078_v8 = vld [vmem:[%s5894_s3 + $0x90] sm:$0xff]   ;;  %v5079_v9 = vld [vmem:[%s5894_s3 + $0xd8] sm:$0xff]  }
  0xe5   :  { %v5080_v10 = vld [vmem:[%s5894_s3 + $0x98] sm:$0xff]  }
  0xe7   :  { %1576 = vmatpush1.bf16.msra.mxu0 %v5001_v11  ;;  %1724 = vmatpush1.bf16.msra.mxu1 %v5004_v12  ;;  %v5081_v11 = vld [vmem:[%s5894_s3 + $0xe0] sm:$0xff]  }
  0xe8   :  { %1725 = vmatprep.subr.bf16.mxu1 %v5011_v13  ;;  %4570 = vmatprep.subr.bf16.mxu0 %v5057_v14  ;;  %v5082_v12 = vld [vmem:[%s5894_s3 + $0xa0] sm:$0xff]   ;;  %v5083_v13 = vld [vmem:[%s5894_s3 + $0xe8] sm:$0xff]  }
  0xe9   :  { %v5084_v14 = vld [vmem:[%s5894_s3 + $0xa8] sm:$0xff]  }
  0xea   :  { %1578 = vmatmul.mubr.bf16.vlgmr.msra.gmra.mrb[0].mxu0 %v4079_v18 }
  0xeb   :  { %1726 = vmatpush1.bf16.msra.mxu1 %v5009_v15  ;;  %4571 = vmatpush3.bf16.msra.mxu0 %v5058_v17  ;;  %v5085_v15 = vld [vmem:[%s5894_s3 + $0xf0] sm:$0xff]  }
  0xec   :  { %1727 = vmatprep.subr.bf16.mxu1 %v5014_v19  ;;  %4572 = vmatprep.subr.bf16.mxu0 %v5059_v20  ;;  %v5086_v17 = vld [vmem:[%s5894_s3 + $0xb0] sm:$0xff]   ;;  %v5088_v19 = vld [vmem:[%s5894_s3 + $0xb8] sm:$0xff]   ;;  %v298_v20 = vlaneseq }
  0xef   :  { %1728 = vmatpush1.bf16.msra.mxu1 %v5012_v21  ;;  %4573 = vmatpush3.bf16.msra.mxu0 %v5060_v22  ;;  %v5773_v21 = vshrl.u32 %v298_v20, 7  ;;  %v5110_v20 = vld [vmem:[#allocation5 + $0xb0] ss:$28 sps:$4 sm:$0xff]  }
  0xf0   :  { %1729 = vmatprep.subr.bf16.mxu1 %v5017_v23  ;;  %4574 = vmatprep.subr.bf16.mxu0 %v5061_v16  ;;  %v296_v23 = vld [vmem:[%s5893_s2] sm:$0xf] }
  0xf1   :  { %v5776_v22 = vsub.s32 0, %v5773_v21  ;;  %v5782_v16 = vsub.s32 1, %v5773_v21 }
  0xf3   :  { %1730 = vmatpush1.bf16.msra.mxu1 %v5015_v24  ;;  %4575 = vmatpush3.bf16.msra.mxu0 %v5062_v25  ;;  %v301_v24 = vrot.slane %v296_v23, %v5776_v22  ;;  %v305_v25 = vrot.slane %v296_v23, %v5782_v16 }
  0xf4   :  { %1731 = vmatprep.subr.bf16.mxu1 %v5020_v26  ;;  %4576 = vmatprep.subr.bf16.mxu0 %v5063_v27 }
  0xf7   :  { %1732 = vmatpush1.bf16.msra.mxu1 %v5018_v28  ;;  %4577 = vmatpush3.bf16.msra.mxu0 %v5064_v29 }
  0xf8   :  { %1733 = vmatprep.subr.bf16.mxu1 %v5023_v30  ;;  %4578 = vmatprep.subr.bf16.mxu0 %v5065_v31 }
  0xfb   :  { %1734 = vmatpush1.bf16.msra.mxu1 %v5021_v32  ;;  %4579 = vmatpush3.bf16.msra.mxu0 %v5066_v33 }
  0xfc   :  { %1735 = vmatprep.subr.bf16.mxu1 %v5026_v34  ;;  %4580 = vmatprep.subr.bf16.mxu0 %v5067_v35 }
  0xff   :  { %1736 = vmatpush1.bf16.msra.mxu1 %v5024_v36  ;;  %4581 = vmatpush3.bf16.msra.mxu0 %v5068_v61 }
 0x100   :  { %1737 = vmatprep.subr.bf16.mxu1 %v5029_v37  ;;  %4582 = vmatprep.subr.bf16.mxu0 %v5069_v62 }
 0x103   :  { %1738 = vmatpush1.bf16.msra.mxu1 %v5027_v38  ;;  %4583 = vmatpush3.bf16.msra.mxu0 %v5070_v63  ;;  %v5789_v38 = vsub.s32 2, %v5773_v21 }
 0x104   :  { %1739 = vmatprep.subr.bf16.mxu1 %v5032_v39  ;;  %4584 = vmatprep.subr.bf16.mxu0 %v5071_v1  ;;  %v5792_v39 = vsub.s32 3, %v5773_v21 }
 0x107   :  { %1740 = vmatpush1.bf16.msra.mxu1 %v5030_v40  ;;  %4585 = vmatpush3.bf16.msra.mxu0 %v5072_v2  ;;  %v309_v40 = vrot.slane %v296_v23, %v5789_v38 }
 0x108   :  { %1750 = vmatprep.subr.bf16.mxu1 %v5035_v41  ;;  %v313_v41 = vrot.slane %v296_v23, %v5792_v39  ;;  %v5115_v23 = vld [vmem:[#allocation5 + $0xe4] ss:$28 sps:$4 sm:$0xff]  }
 0x10a   :  { %1742 = vmatmul.mubr.bf16.vlgmr.msra.gmra.mrb[4].mxu1 %v4079_v18  ;;  %v5087_v18 = vld [vmem:[%s5894_s3 + $0xf8] sm:$0xff]  }
 0x10b   :  { %1751 = vmatpush1.bf16.msra.mxu1 %v5033_v42  ;;  %1782 = vmatprep.mubr.bf16.mxu1 %v5542_v0  ;;  %v5051_v0 = vld [vmem:[#allocation2 + $0x6c8] ss:$16 sps:$4 sm:$0xff]  }
 0x10c   :  { %1752 = vmatprep.subr.bf16.mxu1 %v5038_v43 }
 0x10f   :  { %1753 = vmatpush1.bf16.msra.mxu1 %v5036_v44 }
 0x110   :  { %1754 = vmatprep.subr.bf16.mxu1 %v5041_v45 }
 0x113   :  { %1755 = vmatpush1.bf16.msra.mxu1 %v5039_v46 }
 0x114   :  { %1756 = vmatprep.subr.bf16.mxu1 %v5044_v47 }
 0x117   :  { %1757 = vmatpush1.bf16.msra.mxu1 %v5042_v48 }
 0x118   :  { %1758 = vmatprep.subr.bf16.mxu1 %v5047_v49 }
 0x11b   :  { %1759 = vmatpush1.bf16.msra.mxu1 %v5045_v50 }
 0x11c   :  { %1760 = vmatprep.subr.bf16.mxu1 %v5050_v51 }
 0x11d   :  { %v5703_v54 = vpop.f32.mrb[0].mxu1 }
 0x11e   :  { %v5705_v55 = vpop.f32.mrb[1].mxu1 }
 0x11f   :  { %v1624_v57 = vpop.f32.mrb[2].mxu1  ;;  %1761 = vmatpush1.bf16.msra.mxu1 %v5048_v52 }
 0x120   :  { %v1625_v58 = vpop.f32.mrb[3].mxu1  ;;  %1762 = vmatprep.subr.bf16.mxu1 %v5053_v53 }
 0x123   :  { %1763 = vmatpush1.bf16.msra.mxu1 %v5051_v0 }
 0x124   :  { %1764 = vmatprep.subr.bf16.mxu1 %v5056_v56  ;;  %v4306_v56 = vld [vmem:[%s5895_s4] ss:$0 sm:$0xff]  ;;  %s5543_s4 = smov 127  }
 0x127   :  { %1765 = vmatpush1.bf16.msra.mxu1 %v5054_v59 }
 0x128   :  { %4592 = vmatprep.subr.bf16.mxu1 %v5073_v3  ;;  %v5089_v3 = vld [vmem:[#allocation5] ss:$28 sps:$4 sm:$0xff]  }
 0x12a   :  { %1783 = vmatmul.mubr.bf16.vlgmr.msra.gmra.mrb[4].mxu1 %v5439_v60 }
 0x12b   :  { %4593 = vmatpush3.bf16.msra.mxu1 %v5074_v4  ;;  %v5091_v4 = vld [vmem:[#allocation5 + $0x4] ss:$28 sps:$4 sm:$0xff]  }
 0x12c   :  { %4594 = vmatprep.subr.bf16.mxu1 %v5075_v5  ;;  %v5092_v5 = vld [vmem:[#allocation5 + $0x8] ss:$28 sps:$4 sm:$0xff]   ;;  %3662 = vmatprep.subr.bf16.mxu0 %v5091_v4 }
 0x12f   :  { %4595 = vmatpush3.bf16.msra.mxu1 %v5076_v6  ;;  %v5094_v6 = vld [vmem:[#allocation5 + $0xc] ss:$28 sps:$4 sm:$0xff]  }
 0x130   :  { %4596 = vmatprep.subr.bf16.mxu1 %v5077_v7  ;;  %v5097_v7 = vld [vmem:[#allocation5 + $0x3c] ss:$28 sps:$4 sm:$0xff]  }
 0x133   :  { %4597 = vmatpush3.bf16.msra.mxu1 %v5078_v8  ;;  %v5100_v8 = vld [vmem:[#allocation5 + $0x44] ss:$28 sps:$4 sm:$0xff]  }
 0x134   :  { %4598 = vmatprep.subr.bf16.mxu1 %v5079_v9  ;;  %v5095_v9 = vld [vmem:[#allocation5 + $0x38] ss:$28 sps:$4 sm:$0xff]  }
 0x137   :  { %4599 = vmatpush3.bf16.msra.mxu1 %v5080_v10  ;;  %v5098_v10 = vld [vmem:[#allocation5 + $0x40] ss:$28 sps:$4 sm:$0xff]  }
 0x138   :  { %4600 = vmatprep.subr.bf16.mxu1 %v5081_v11  ;;  %v5103_v11 = vld [vmem:[#allocation5 + $0x74] ss:$28 sps:$4 sm:$0xff]  }
 0x13b   :  { %4601 = vmatpush3.bf16.msra.mxu1 %v5082_v12  ;;  %v5106_v12 = vld [vmem:[#allocation5 + $0x7c] ss:$28 sps:$4 sm:$0xff]  }
 0x13c   :  { %4602 = vmatprep.subr.bf16.mxu1 %v5083_v13  ;;  %v5101_v13 = vld [vmem:[#allocation5 + $0x70] ss:$28 sps:$4 sm:$0xff]  }
 0x13f   :  { %4603 = vmatpush3.bf16.msra.mxu1 %v5084_v14 }
 0x140   :  { %4604 = vmatprep.subr.bf16.mxu1 %v5085_v15  ;;  %v5104_v15 = vld [vmem:[#allocation5 + $0x78] ss:$28 sps:$4 sm:$0xff]  }
 0x143   :  { %4605 = vmatpush3.bf16.msra.mxu1 %v5086_v17  ;;  %v5109_v17 = vld [vmem:[#allocation5 + $0xac] ss:$28 sps:$4 sm:$0xff]  }
 0x144   :  { %4606 = vmatprep.subr.bf16.mxu1 %v5087_v18  ;;  %v5112_v18 = vld [vmem:[#allocation5 + $0xb4] ss:$28 sps:$4 sm:$0xff]  }
 0x147   :  { %4607 = vmatpush3.bf16.msra.mxu1 %v5088_v19  ;;  %v5107_v19 = vld [vmem:[#allocation5 + $0xa8] ss:$28 sps:$4 sm:$0xff]  }
 0x148   :  { %3744 = vmatprep.subr.bf16.mxu1 %v5094_v6  ;;  %v5175_v6 = vld [vmem:[#allocation5 + $0x314] ss:$28 sps:$4 sm:$0xff]  }
 0x1bd   :  { %v1579_v26 = vpop.f32.mrb[0].mxu0 }
 0x1be   :  { %v4658_v27 = vadd.f32 %v1579_v26, %v301_v24  ;;  %v1581_v28 = vpop.f32.mrb[1].mxu0  ;;  %v5118_v24 = vld [vmem:[#allocation5 + $0xec] ss:$28 sps:$4 sm:$0xff]  }
 0x1bf   :  { %v4660_v29 = vadd.f32 %v1581_v28, %v305_v25  ;;  %v1583_v30 = vpop.f32.mrb[2].mxu0  ;;  %v5113_v25 = vld [vmem:[#allocation5 + $0xe0] ss:$28 sps:$4 sm:$0xff]   ;;  %v5116_v26 = vld [vmem:[#allocation5 + $0xe8] ss:$28 sps:$4 sm:$0xff]  }
 0x1c0   :  { %v4659_v31 = vadd.f32 %v4658_v27, %v5703_v54  ;;  %v1584_v32 = vpop.f32.mrb[3].mxu0  ;;  %v5121_v27 = vld [vmem:[#allocation5 + $0x11c] ss:$28 sps:$4 sm:$0xff]   ;;  %v5124_v28 = vld [vmem:[#allocation5 + $0x124] ss:$28 sps:$4 sm:$0xff]  }
 0x1c1   :  { %v4661_v33 = vadd.f32 %v4660_v29, %v5705_v55  ;;  %v5119_v29 = vld [vmem:[#allocation5 + $0x118] ss:$28 sps:$4 sm:$0xff]   ;;  %v5122_v30 = vld [vmem:[#allocation5 + $0x120] ss:$28 sps:$4 sm:$0xff]  }
 0x1c2   :  { %v1791_v34 = vmax.f32 %v4659_v31, 0.0  ;;  %v5127_v31 = vld [vmem:[#allocation5 + $0x154] ss:$28 sps:$4 sm:$0xff]   ;;  %v5130_v32 = vld [vmem:[#allocation5 + $0x15c] ss:$28 sps:$4 sm:$0xff]  }
 0x1c3   :  { %v1792_v35 = vmax.f32 %v4661_v33, 0.0  ;;  %v5125_v33 = vld [vmem:[#allocation5 + $0x150] ss:$28 sps:$4 sm:$0xff]  }
 0x1c4   :  { %v1795_v37 = vpack.c.bf16 %v1791_v34, %v1791_v34  ;;  %v5128_v34 = vld [vmem:[#allocation5 + $0x158] ss:$28 sps:$4 sm:$0xff]  }
 0x1c5   :  { %v1796_v36 = vpack.c.bf16 %v1792_v35, %v1792_v35  ;;  %v5133_v35 = vld [vmem:[#allocation5 + $0x18c] ss:$28 sps:$4 sm:$0xff]  }
 0x1c7   :  { %2094 = vmatprep.mubr.bf16.mxu0 %v1796_v36  ;;  %v5136_v36 = vld [vmem:[#allocation5 + $0x194] ss:$28 sps:$4 sm:$0xff]  }
 0x1c8   :  { %2095 = vmatmul.mubr.bf16.vlgmr.msra.gmra.mrb[4].mxu0 %v1795_v37  ;;  %v5131_v37 = vld [vmem:[#allocation5 + $0x188] ss:$28 sps:$4 sm:$0xff]  }
 0x1c9   :  { %3663 = vmatpush1.bf16.msra.mxu0 %v5089_v3 }
 0x1ca   :  { %3664 = vmatprep.subr.bf16.mxu0 %v5097_v7  ;;  %v5178_v7 = vld [vmem:[#allocation5 + $0x31c] ss:$28 sps:$4 sm:$0xff]  }
 0x1cd   :  { %3665 = vmatpush1.bf16.msra.mxu0 %v5095_v9  ;;  %v5176_v9 = vld [vmem:[#allocation5 + $0x318] ss:$28 sps:$4 sm:$0xff]  }
 0x1ce   :  { %3666 = vmatprep.subr.bf16.mxu0 %v5103_v11  ;;  %v5184_v11 = vld [vmem:[#allocation5 + $0x354] ss:$28 sps:$4 sm:$0xff]  }
 0x1d1   :  { %3667 = vmatpush1.bf16.msra.mxu0 %v5101_v13  ;;  %v5182_v13 = vld [vmem:[#allocation5 + $0x350] ss:$28 sps:$4 sm:$0xff]  }
 0x1d2   :  { %3668 = vmatprep.subr.bf16.mxu0 %v5109_v17 }
 0x1d5   :  { %3669 = vmatpush1.bf16.msra.mxu0 %v5107_v19 }
 0x1d6   :  { %3670 = vmatprep.subr.bf16.mxu0 %v5115_v23  ;;  %v2152_v23 = vld [vmem:[%s5898_s7] sm:$0xf] }
 0x1d9   :  { %3671 = vmatpush1.bf16.msra.mxu0 %v5113_v25 }
 0x1da   :  { %3672 = vmatprep.subr.bf16.mxu0 %v5121_v27 }
 0x1dd   :  { %3673 = vmatpush1.bf16.msra.mxu0 %v5119_v29  ;;  %v2196_v29 = vrot.slane %v2152_v23, %v5789_v38 }
 0x1de   :  { %3674 = vmatprep.subr.bf16.mxu0 %v5127_v31 }
 0x1e1   :  { %3675 = vmatpush1.bf16.msra.mxu0 %v5125_v33 }
 0x1e2   :  { %3676 = vmatprep.subr.bf16.mxu0 %v5133_v35 }
 0x1e5   :  { %3677 = vmatpush1.bf16.msra.mxu0 %v5131_v37 }
 0x1fd   :  { %v1784_v42 = vpop.f32.mrb[4].mxu1 }
 0x1fe   :  { %v4662_v43 = vadd.f32 %v1784_v42, %v309_v40  ;;  %v1786_v44 = vpop.f32.mrb[5].mxu1  ;;  %v5134_v40 = vld [vmem:[#allocation5 + $0x190] ss:$28 sps:$4 sm:$0xff]  }
 0x1ff   :  { %v4663_v45 = vadd.f32 %v1786_v44, %v313_v41  ;;  %v1788_v46 = vpop.f32.mrb[6].mxu1  ;;  %v5139_v41 = vld [vmem:[#allocation5 + $0x1c4] ss:$28 sps:$4 sm:$0xff]   ;;  %v5142_v42 = vld [vmem:[#allocation5 + $0x1cc] ss:$28 sps:$4 sm:$0xff]  }
 0x200   :  { %v1793_v47 = vmax.f32 %v4662_v43, 0.0  ;;  %v1789_v48 = vpop.f32.mrb[7].mxu1  ;;  %v5137_v43 = vld [vmem:[#allocation5 + $0x1c0] ss:$28 sps:$4 sm:$0xff]   ;;  %3678 = vmatprep.subr.bf16.mxu0 %v5139_v41  ;;  %v5140_v44 = vld [vmem:[#allocation5 + $0x1c8] ss:$28 sps:$4 sm:$0xff]  }
 0x201   :  { %v1794_v49 = vmax.f32 %v4663_v45, 0.0  ;;  %v5145_v45 = vld [vmem:[#allocation5 + $0x1fc] ss:$28 sps:$4 sm:$0xff]   ;;  %v5148_v46 = vld [vmem:[#allocation5 + $0x204] ss:$28 sps:$4 sm:$0xff]   ;;  %3679 = vmatpush1.bf16.msra.mxu0 %v5137_v43 }
 0x202   :  { %v1797_v51 = vpack.c.bf16 %v1793_v47, %v1793_v47  ;;  %v5143_v47 = vld [vmem:[#allocation5 + $0x1f8] ss:$28 sps:$4 sm:$0xff]   ;;  %3680 = vmatprep.subr.bf16.mxu0 %v5145_v45  ;;  %v5146_v48 = vld [vmem:[#allocation5 + $0x200] ss:$28 sps:$4 sm:$0xff]  }
 0x203   :  { %v1798_v50 = vpack.c.bf16 %v1794_v49, %v1794_v49  ;;  %v5151_v49 = vld [vmem:[#allocation5 + $0x234] ss:$28 sps:$4 sm:$0xff]  }
 0x205   :  { %2134 = vmatprep.mubr.bf16.mxu1 %v1798_v50  ;;  %v5154_v50 = vld [vmem:[#allocation5 + $0x23c] ss:$28 sps:$4 sm:$0xff]   ;;  %3681 = vmatpush1.bf16.msra.mxu0 %v5143_v47 }
 0x206   :  { %2135 = vmatmul.mubr.bf16.vlgmr.msra.gmra.mrb[8].mxu1 %v1797_v51  ;;  %v5149_v51 = vld [vmem:[#allocation5 + $0x230] ss:$28 sps:$4 sm:$0xff]   ;;  %3682 = vmatprep.subr.bf16.mxu0 %v5151_v49  ;;  %v5185_v47 = vld [vmem:[#allocation5 + $0x380] ss:$28 sps:$4 sm:$0xff]  }
 0x207   :  { %3745 = vmatpush1.bf16.msra.mxu1 %v5092_v5  ;;  %v5193_v49 = vld [vmem:[#allocation5 + $0x3bc] ss:$28 sps:$4 sm:$0xff]  }
 0x208   :  { %3746 = vmatprep.subr.bf16.mxu1 %v5100_v8  ;;  %v5173_v8 = vld [vmem:[#allocation5 + $0x310] ss:$28 sps:$4 sm:$0xff]  }
 0x209   :  { %3683 = vmatpush1.bf16.msra.mxu0 %v5149_v51 }
 0x20b   :  { %3747 = vmatpush1.bf16.msra.mxu1 %v5098_v10  ;;  %v5181_v10 = vld [vmem:[#allocation5 + $0x34c] ss:$28 sps:$4 sm:$0xff]  }
 0x20c   :  { %3748 = vmatprep.subr.bf16.mxu1 %v5106_v12  ;;  %v5179_v12 = vld [vmem:[#allocation5 + $0x348] ss:$28 sps:$4 sm:$0xff]  }
 0x20f   :  { %3749 = vmatpush1.bf16.msra.mxu1 %v5104_v15  ;;  %v5190_v15 = vld [vmem:[#allocation5 + $0x38c] ss:$28 sps:$4 sm:$0xff]  }
 0x210   :  { %3750 = vmatprep.subr.bf16.mxu1 %v5112_v18 }
 0x213   :  { %3751 = vmatpush1.bf16.msra.mxu1 %v5110_v20  ;;  %v2153_v20 = vld [vmem:[%s5897_s6] sm:$0xf] }
 0x214   :  { %3752 = vmatprep.subr.bf16.mxu1 %v5118_v24  ;;  %v2163_v24 = vrot.slane %v2153_v20, %v5776_v22  ;;  %v2167_v25 = vrot.slane %v2153_v20, %v5782_v16  ;;  %v2175_v27 = vrot.slane %v2153_v20, %v5792_v39 }
 0x217   :  { %3753 = vmatpush1.bf16.msra.mxu1 %v5116_v26  ;;  %v2171_v26 = vrot.slane %v2153_v20, %v5789_v38  ;;  %v5241_v20 = vld [vmem:[#allocation5 + $0x57c] ss:$28 sps:$4 sm:$0xff]  }
 0x218   :  { %3754 = vmatprep.subr.bf16.mxu1 %v5124_v28  ;;  %v2192_v28 = vrot.slane %v2152_v23, %v5782_v16 }
 0x21b   :  { %3755 = vmatpush1.bf16.msra.mxu1 %v5122_v30  ;;  %v2200_v30 = vrot.slane %v2152_v23, %v5792_v39 }
 0x21c   :  { %3756 = vmatprep.subr.bf16.mxu1 %v5130_v32 }
 0x21f   :  { %3757 = vmatpush1.bf16.msra.mxu1 %v5128_v34 }
 0x220   :  { %3758 = vmatprep.subr.bf16.mxu1 %v5136_v36 }
 0x223   :  { %3759 = vmatpush1.bf16.msra.mxu1 %v5134_v40 }
 0x224   :  { %3760 = vmatprep.subr.bf16.mxu1 %v5142_v42 }
 0x227   :  { %3761 = vmatpush1.bf16.msra.mxu1 %v5140_v44 }
 0x228   :  { %3762 = vmatprep.subr.bf16.mxu1 %v5148_v46 }
 0x22b   :  { %3763 = vmatpush1.bf16.msra.mxu1 %v5146_v48  ;;  %v5188_v48 = vld [vmem:[#allocation5 + $0x388] ss:$28 sps:$4 sm:$0xff]  }
 0x22c   :  { %3764 = vmatprep.subr.bf16.mxu1 %v5154_v50  ;;  %v5196_v50 = vld [vmem:[#allocation5 + $0x3c4] ss:$28 sps:$4 sm:$0xff]  }
 0x29b   :  { %v4586_v52 = vpop.f32.mrb[4].mxu0 }
 0x29c   :  { %v4587_v53 = vpop.f32.mrb[5].mxu0 }
 0x29d   :  { %v4588_v54 = vadd.f32 %v4587_v53, %v4586_v52  ;;  %v4589_v0 = vpop.f32.mrb[6].mxu0  ;;  %v5152_v52 = vld [vmem:[#allocation5 + $0x238] ss:$28 sps:$4 sm:$0xff]   ;;  %v5157_v53 = vld [vmem:[#allocation5 + $0x26c] ss:$28 sps:$4 sm:$0xff]  }
 0x29e   :  { %v4590_v55 = vpop.f32.mrb[7].mxu0  ;;  %3765 = vmatpush1.bf16.msra.mxu1 %v5152_v52  ;;  %v5155_v0 = vld [vmem:[#allocation5 + $0x268] ss:$28 sps:$4 sm:$0xff]   ;;  %3684 = vmatprep.subr.bf16.mxu0 %v5157_v53  ;;  %v5191_v52 = vld [vmem:[#allocation5 + $0x3b8] ss:$28 sps:$4 sm:$0xff]  }
 0x29f   :  { %v2097_v59 = vadd.f32 %v4588_v54, %v4306_v56  ;;  %v5160_v54 = vld [vmem:[#allocation5 + $0x274] ss:$28 sps:$4 sm:$0xff]   ;;  %v5163_v56 = vld [vmem:[#allocation5 + $0x2a4] ss:$28 sps:$4 sm:$0xff]   ;;  %3685 = vmatpush1.bf16.msra.mxu0 %v5155_v0  ;;  %v5202_v0 = vld [vmem:[#allocation5 + $0x3fc] ss:$28 sps:$4 sm:$0xff]  }
 0x2a0   :  { %v5158_v55 = vld [vmem:[#allocation5 + $0x270] ss:$28 sps:$4 sm:$0xff]   ;;  %3766 = vmatprep.subr.bf16.mxu1 %v5160_v54  ;;  %3686 = vmatprep.subr.bf16.mxu0 %v5163_v56  ;;  %v5194_v53 = vld [vmem:[#allocation5 + $0x3c0] ss:$28 sps:$4 sm:$0xff]   ;;  %v5200_v56 = vld [vmem:[#allocation5 + $0x3f8] ss:$28 sps:$4 sm:$0xff]  }
 0x2a1   :  { %v5199_v54 = vld [vmem:[#allocation5 + $0x3f4] ss:$28 sps:$4 sm:$0xff]  }
 0x2a2   :  { %3767 = vmatpush1.bf16.msra.mxu1 %v5158_v55  ;;  %v5197_v55 = vld [vmem:[#allocation5 + $0x3f0] ss:$28 sps:$4 sm:$0xff]  }
 0x2d9   :  { %v4608_v57 = vpop.f32.mrb[8].mxu1 }
 0x2da   :  { %v4609_v58 = vpop.f32.mrb[9].mxu1 }
 0x2db   :  { %v4610_v60 = vadd.f32 %v4609_v58, %v4608_v57  ;;  %v4611_v61 = vpop.f32.mrb[10].mxu1  ;;  %v5166_v57 = vld [vmem:[#allocation5 + $0x2ac] ss:$28 sps:$4 sm:$0xff]   ;;  %v5161_v58 = vld [vmem:[#allocation5 + $0x2a0] ss:$28 sps:$4 sm:$0xff]  }
 0x2dc   :  { %v4612_v62 = vpop.f32.mrb[11].mxu1  ;;  %3768 = vmatprep.subr.bf16.mxu1 %v5166_v57  ;;  %v5172_v61 = vld [vmem:[#allocation5 + $0x2e4] ss:$28 sps:$4 sm:$0xff]   ;;  %3687 = vmatpush1.bf16.msra.mxu0 %v5161_v58  ;;  %v5205_v57 = vld [vmem:[#allocation5 + $0x42c] ss:$28 sps:$4 sm:$0xff]  }
 0x2dd   :  { %v5799_v63 = vadd.f32 %v4610_v60, %v2097_v59  ;;  %v5164_v59 = vld [vmem:[#allocation5 + $0x2a8] ss:$28 sps:$4 sm:$0xff]   ;;  %v5169_v60 = vld [vmem:[#allocation5 + $0x2dc] ss:$28 sps:$4 sm:$0xff]   ;;  %v5208_v58 = vld [vmem:[#allocation5 + $0x434] ss:$28 sps:$4 sm:$0xff]  }
 0x2de   :  { %v2142_v62 = vld [vmem:[%s5896_s5] sm:$0xff]  ;;  %3769 = vmatpush1.bf16.msra.mxu1 %v5164_v59  ;;  %3688 = vmatprep.subr.bf16.mxu0 %v5169_v60  ;;  %v5206_v60 = vld [vmem:[#allocation5 + $0x430] ss:$28 sps:$4 sm:$0xff]  }
 0x2df   :  { %v2143_v1 = vmul.f32 0.5, %v5799_v63  ;;  %3770 = vmatprep.subr.bf16.mxu1 %v5172_v61  ;;  %v5203_v59 = vld [vmem:[#allocation5 + $0x428] ss:$28 sps:$4 sm:$0xff]  }
 0x2e0   :  { %v5211_v61 = vld [vmem:[#allocation5 + $0x464] ss:$28 sps:$4 sm:$0xff]  }
 0x2e1   :  { %v2144_v2 = vmul.f32 1.442695, %v2143_v1  ;;  %v5167_v1 = vld [vmem:[#allocation5 + $0x2d8] ss:$28 sps:$4 sm:$0xff]  }
 0x2e2   :  { %3689 = vmatpush1.bf16.msra.mxu0 %v5167_v1  ;;  %v5209_v1 = vld [vmem:[#allocation5 + $0x460] ss:$28 sps:$4 sm:$0xff]  }
 0x2e3   :  { %5409 = vpow2.f32 %v2144_v2  ;;  %v5170_v2 = vld [vmem:[#allocation5 + $0x2e0] ss:$28 sps:$4 sm:$0xff]   ;;  %3690 = vmatprep.subr.bf16.mxu0 %v5175_v6 }
 0x2e4   :  { %3771 = vmatpush1.bf16.msra.mxu1 %v5170_v2  ;;  %v5212_v2 = vld [vmem:[#allocation5 + $0x468] ss:$28 sps:$4 sm:$0xff]   ;;  %v5218_v6 = vld [vmem:[#allocation5 + $0x4a0] ss:$28 sps:$4 sm:$0xff]  }
 0x2e5   :  { %3772 = vmatprep.subr.bf16.mxu1 %v5178_v7  ;;  %v5223_v7 = vld [vmem:[#allocation5 + $0x4d4] ss:$28 sps:$4 sm:$0xff]  }
 0x2e6   :  { %3691 = vmatpush1.bf16.msra.mxu0 %v5173_v8  ;;  %v5226_v8 = vld [vmem:[#allocation5 + $0x4dc] ss:$28 sps:$4 sm:$0xff]  }
 0x2e7   :  { %3692 = vmatprep.subr.bf16.mxu0 %v5181_v10  ;;  %v5224_v10 = vld [vmem:[#allocation5 + $0x4d8] ss:$28 sps:$4 sm:$0xff]  }
 0x2e8   :  { %3773 = vmatpush1.bf16.msra.mxu1 %v5176_v9  ;;  %v5221_v9 = vld [vmem:[#allocation5 + $0x4d0] ss:$28 sps:$4 sm:$0xff]  }
 0x2e9   :  { %3774 = vmatprep.subr.bf16.mxu1 %v5184_v11  ;;  %v5229_v11 = vld [vmem:[#allocation5 + $0x50c] ss:$28 sps:$4 sm:$0xff]  }
 0x2ea   :  { %3693 = vmatpush1.bf16.msra.mxu0 %v5179_v12  ;;  %v5232_v12 = vld [vmem:[#allocation5 + $0x514] ss:$28 sps:$4 sm:$0xff]  }
 0x2ec   :  { %3775 = vmatpush1.bf16.msra.mxu1 %v5182_v13  ;;  %v5227_v13 = vld [vmem:[#allocation5 + $0x508] ss:$28 sps:$4 sm:$0xff]  }
 0x2ed   :  { %v5410_v14 = vpop.eup %5409  ;;  %3785 = vmatprep.subr.bf16.mxu1 %v5190_v15  ;;  %v5235_v15 = vld [vmem:[#allocation5 + $0x544] ss:$28 sps:$4 sm:$0xff]  }
 0x2ee   :  { %2147 = vrot.lane.b32.xlu0 %v5410_v14, %s5543_s4  ;;  %v5187_v14 = vld [vmem:[#allocation5 + $0x384] ss:$28 sps:$4 sm:$0xff]  }
 0x2ef   :  { %3703 = vmatprep.subr.bf16.mxu0 %v5187_v14  ;;  %v5230_v14 = vld [vmem:[#allocation5 + $0x510] ss:$28 sps:$4 sm:$0xff]  }
 0x360   :  { %v2148_v3 = vpop.permute.xlu0 %2147 }
 0x361   :  { %v2150_v4 = vmul.f32 %v2148_v3, %v2142_v62  ;;  %v5214_v62 = vld [vmem:[#allocation5 + $0x46c] ss:$28 sps:$4 sm:$0xff]   ;;  %v5217_v3 = vld [vmem:[#allocation5 + $0x49c] ss:$28 sps:$4 sm:$0xff]  }
 0x363   :  { %v2151_v5 = vadd.f32 %v2150_v4, %v5799_v63  ;;  %v5220_v4 = vld [vmem:[#allocation5 + $0x4a4] ss:$28 sps:$4 sm:$0xff]  }
 0x365   :  { %4037 = vrot.lane.b32.xlu1 %v2151_v5, %s5544_s19  ;;  %2156 = vperm.xlu0 %4713, %v2151_v5   ;;  %v5215_v5 = vld [vmem:[#allocation5 + $0x498] ss:$28 sps:$4 sm:$0xff]  }
 0x3d7   :  { %v4038_v17 = vpop.permute.xlu1 %4037 }
 0x3d8   :  { %v4041_v18 = vsel %vm4040_vm0, %v5799_v63, %v4038_v17  ;;  %v2188_v63 = vrot.slane %v2152_v23, %v5776_v22  ;;  %v5238_v17 = vld [vmem:[#allocation5 + $0x54c] ss:$28 sps:$4 sm:$0xff]   ;;  %v5244_v23 = vld [vmem:[#allocation5 + $0x584] ss:$28 sps:$4 sm:$0xff]  }
 0x3d9   :  { %v4043_v19 = vsel %vm4042_vm1, %v4041_v18, 0.0  ;;  %v5233_v18 = vld [vmem:[#allocation5 + $0x540] ss:$28 sps:$4 sm:$0xff]  }
 0x3da   :  { %4044 = vst [vmem:[#allocation8] sm:$0xff] %v4043_v19  ;;  %v5236_v19 = vld [vmem:[#allocation5 + $0x548] ss:$28 sps:$4 sm:$0xff]  }
 0x3e4   :  { %v2157_v31 = vpop.permute.xlu0 %2156 }
 0x3e5   :  { %v2180_v32 = vmul.f32 %v2163_v24, %v2157_v31  ;;  %v2181_v33 = vmul.f32 %v2167_v25, %v2157_v31  ;;  %v2182_v34 = vmul.f32 %v2171_v26, %v2157_v31  ;;  %v2183_v35 = vmul.f32 %v2175_v27, %v2157_v31  ;;  %v5239_v24 = vld [vmem:[#allocation5 + $0x578] ss:$28 sps:$4 sm:$0xff]   ;;  %v5242_v25 = vld [vmem:[#allocation5 + $0x580] ss:$28 sps:$4 sm:$0xff]   ;;  %v5251_v31 = vld [vmem:[#allocation5 + $0x5e8] ss:$28 sps:$4 sm:$0xff]  }
 0x3e6   :  { %v5247_v26 = vld [vmem:[#allocation5 + $0x5b4] ss:$28 sps:$4 sm:$0xff]   ;;  %v5250_v27 = vld [vmem:[#allocation5 + $0x5bc] ss:$28 sps:$4 sm:$0xff]  }
 0x3e7   :  { %v2205_v36 = vadd.f32 %v2188_v63, %v2180_v32  ;;  %v2206_v37 = vadd.f32 %v2192_v28, %v2181_v33  ;;  %v5821_v40 = vadd.f32 %v2196_v29, %v2182_v34  ;;  %v2208_v41 = vadd.f32 %v2200_v30, %v2183_v35  ;;  %v5245_v63 = vld [vmem:[#allocation5 + $0x5b0] ss:$28 sps:$4 sm:$0xff]   ;;  %v5248_v28 = vld [vmem:[#allocation5 + $0x5b8] ss:$28 sps:$4 sm:$0xff]   ;;  %v5259_v33 = vld [vmem:[#allocation5 + $0x624] ss:$28 sps:$4 sm:$0xff]  }
 0x3e8   :  { %v5253_v29 = vld [vmem:[#allocation5 + $0x5ec] ss:$28 sps:$4 sm:$0xff]   ;;  %v5256_v30 = vld [vmem:[#allocation5 + $0x5f4] ss:$28 sps:$4 sm:$0xff]   ;;  %v5257_v35 = vld [vmem:[#allocation5 + $0x620] ss:$28 sps:$4 sm:$0xff]  }
 0x3e9   :  { %v2209_v42 = vmax.f32 %v2205_v36, 0.0  ;;  %v2210_v43 = vmax.f32 %v2206_v37, 0.0  ;;  %v2212_v44 = vmax.f32 %v2208_v41, 0.0  ;;  %v5254_v32 = vld [vmem:[#allocation5 + $0x5f0] ss:$28 sps:$4 sm:$0xff]  }
 0x3ea   :  { %v5262_v34 = vld [vmem:[#allocation5 + $0x62c] ss:$28 sps:$4 sm:$0xff]   ;;  %v5265_v37 = vld [vmem:[#allocation5 + $0x65c] ss:$28 sps:$4 sm:$0xff]   ;;  %v5268_v41 = vld [vmem:[#allocation5 + $0x664] ss:$28 sps:$4 sm:$0xff]  }
 0x3eb   :  { %v5823_v45 = vpack.c.bf16 %v2209_v42, %v2209_v42  ;;  %v5825_v46 = vpack.c.bf16 %v2210_v43, %v2210_v43  ;;  %v5829_v51 = vpack.c.bf16 %v2212_v44, %v2212_v44  ;;  %v5260_v36 = vld [vmem:[#allocation5 + $0x628] ss:$28 sps:$4 sm:$0xff]   ;;  %v5263_v42 = vld [vmem:[#allocation5 + $0x658] ss:$28 sps:$4 sm:$0xff]   ;;  %v5266_v43 = vld [vmem:[#allocation5 + $0x660] ss:$28 sps:$4 sm:$0xff]  }
 0x3ec   :  { %v5271_v44 = vld [vmem:[#allocation5 + $0x694] ss:$28 sps:$4 sm:$0xff]  }
 0x3ed   :  { %3694 = vmatprep.mubr.bf16.mxu0 %v5825_v46  ;;  %3776 = vmatprep.mubr.bf16.mxu1 %v5825_v46 }
 0x3ee   :  { %3695 = vmatmul.mubr.bf16.vlgmr.msra.gmra.mrb[8].mxu0 %v5823_v45  ;;  %3777 = vmatmul.mubr.bf16.vlgmr.msra.gmra.mrb[12].mxu1 %v5823_v45 }
 0x3ef   :  { %3704 = vmatpush1.bf16.msra.mxu0 %v5185_v47  ;;  %3786 = vmatpush1.bf16.msra.mxu1 %v5188_v48  ;;  %v5274_v47 = vld [vmem:[#allocation5 + $0x69c] ss:$28 sps:$4 sm:$0xff]   ;;  %v5269_v48 = vld [vmem:[#allocation5 + $0x690] ss:$28 sps:$4 sm:$0xff]  }
 0x3f0   :  { %3735 = vmatprep.mubr.bf16.mxu0 %v5829_v51  ;;  %3817 = vmatprep.mubr.bf16.mxu1 %v5829_v51 }
 0x3f1   :  { %3705 = vmatprep.subr.bf16.mxu0 %v5193_v49  ;;  %3787 = vmatprep.subr.bf16.mxu1 %v5196_v50  ;;  %v5272_v49 = vld [vmem:[#allocation5 + $0x698] ss:$28 sps:$4 sm:$0xff]   ;;  %v5277_v50 = vld [vmem:[#allocation5 + $0x6cc] ss:$28 sps:$4 sm:$0xff]  }
 0x3f3   :  { %3706 = vmatpush1.bf16.msra.mxu0 %v5191_v52  ;;  %3788 = vmatpush1.bf16.msra.mxu1 %v5194_v53  ;;  %v5280_v52 = vld [vmem:[#allocation5 + $0x6d4] ss:$28 sps:$4 sm:$0xff]   ;;  %v5275_v53 = vld [vmem:[#allocation5 + $0x6c8] ss:$28 sps:$4 sm:$0xff]  }
 0x3f4   :  { %3707 = vmatprep.subr.bf16.mxu0 %v5199_v54  ;;  %3789 = vmatprep.subr.bf16.mxu1 %v5202_v0  ;;  %v5278_v54 = vld [vmem:[#allocation5 + $0x6d0] ss:$28 sps:$4 sm:$0xff]   ;;  %v2211_v0 = vmax.f32 %v5821_v40, 0.0  ;;  %v5286_v40 = vld [vmem:[#allocation5 + $0x48] ss:$28 sps:$4 sm:$0xff]  }
 0x3f7   :  { %3708 = vmatpush1.bf16.msra.mxu0 %v5197_v55  ;;  %3790 = vmatpush1.bf16.msra.mxu1 %v5200_v56  ;;  %v5283_v55 = vld [vmem:[#allocation5 + $0x14] ss:$28 sps:$4 sm:$0xff]  }
 0x3f8   :  { %3709 = vmatprep.subr.bf16.mxu0 %v5205_v57  ;;  %3791 = vmatprep.subr.bf16.mxu1 %v5208_v58  ;;  %v5284_v56 = vld [vmem:[#allocation5 + $0x1d8] ss:$28 sps:$4 sm:$0xff]   ;;  %v5281_v57 = vld [vmem:[#allocation5 + $0x10] ss:$28 sps:$4 sm:$0xff]   ;;  %v5836_v58 = vpack.c.bf16 %v2211_v0, %v2211_v0 }
 0x3f9   :  { %v5350_v0 = vld [vmem:[#allocation5 + $0x4b0] ss:$28 sps:$4 sm:$0xff]  }
 0x3fb   :  { %3710 = vmatpush1.bf16.msra.mxu0 %v5203_v59  ;;  %3792 = vmatpush1.bf16.msra.mxu1 %v5206_v60  ;;  %v5285_v59 = vld [vmem:[#allocation5 + $0x18] ss:$28 sps:$4 sm:$0xff]   ;;  %v5288_v60 = vld [vmem:[#allocation5 + $0x4c] ss:$28 sps:$4 sm:$0xff]  }
 0x3fc   :  { %3711 = vmatprep.subr.bf16.mxu0 %v5211_v61  ;;  %3793 = vmatprep.subr.bf16.mxu1 %v5214_v62  ;;  %v5289_v61 = vld [vmem:[#allocation5 + $0x210] ss:$28 sps:$4 sm:$0xff]  }
 0x3fd   :  { %v5290_v62 = vld [vmem:[#allocation5 + $0x50] ss:$28 sps:$4 sm:$0xff]  }
 0x3ff   :  { %3712 = vmatpush1.bf16.msra.mxu0 %v5209_v1  ;;  %3794 = vmatpush1.bf16.msra.mxu1 %v5212_v2  ;;  %v5293_v1 = vld [vmem:[#allocation5 + $0x84] ss:$28 sps:$4 sm:$0xff]  }
 0x400   :  { %3713 = vmatprep.subr.bf16.mxu0 %v5217_v3  ;;  %3795 = vmatprep.subr.bf16.mxu1 %v5220_v4  ;;  %v5294_v2 = vld [vmem:[#allocation5 + $0x248] ss:$28 sps:$4 sm:$0xff]   ;;  %v5291_v3 = vld [vmem:[#allocation5 + $0x80] ss:$28 sps:$4 sm:$0xff]  }
 0x401   :  { %v5295_v4 = vld [vmem:[#allocation5 + $0x88] ss:$28 sps:$4 sm:$0xff]  }
 0x403   :  { %3714 = vmatpush1.bf16.msra.mxu0 %v5215_v5  ;;  %3796 = vmatpush1.bf16.msra.mxu1 %v5218_v6  ;;  %v5298_v5 = vld [vmem:[#allocation5 + $0xbc] ss:$28 sps:$4 sm:$0xff]  }
 0x404   :  { %3715 = vmatprep.subr.bf16.mxu0 %v5223_v7  ;;  %3797 = vmatprep.subr.bf16.mxu1 %v5226_v8  ;;  %v5299_v6 = vld [vmem:[#allocation5 + $0x280] ss:$28 sps:$4 sm:$0xff]   ;;  %v5296_v7 = vld [vmem:[#allocation5 + $0xb8] ss:$28 sps:$4 sm:$0xff]  }
 0x405   :  { %v5300_v8 = vld [vmem:[#allocation5 + $0xc0] ss:$28 sps:$4 sm:$0xff]  }
 0x407   :  { %3716 = vmatpush1.bf16.msra.mxu0 %v5221_v9  ;;  %3798 = vmatpush1.bf16.msra.mxu1 %v5224_v10  ;;  %v5303_v9 = vld [vmem:[#allocation5 + $0xf4] ss:$28 sps:$4 sm:$0xff]  }
 0x408   :  { %3717 = vmatprep.subr.bf16.mxu0 %v5229_v11  ;;  %3799 = vmatprep.subr.bf16.mxu1 %v5232_v12  ;;  %v5301_v10 = vld [vmem:[#allocation5 + $0xf0] ss:$28 sps:$4 sm:$0xff]   ;;  %v5305_v11 = vld [vmem:[#allocation5 + $0xf8] ss:$28 sps:$4 sm:$0xff]  }
 0x409   :  { %v5308_v12 = vld [vmem:[#allocation5 + $0x12c] ss:$28 sps:$4 sm:$0xff]  }
 0x40b   :  { %3718 = vmatpush1.bf16.msra.mxu0 %v5227_v13  ;;  %3800 = vmatpush1.bf16.msra.mxu1 %v5230_v14  ;;  %v5309_v13 = vld [vmem:[#allocation5 + $0x2f0] ss:$28 sps:$4 sm:$0xff]   ;;  %v5306_v14 = vld [vmem:[#allocation5 + $0x128] ss:$28 sps:$4 sm:$0xff]  }
 0x40c   :  { %3719 = vmatprep.subr.bf16.mxu0 %v5235_v15  ;;  %3801 = vmatprep.subr.bf16.mxu1 %v5238_v17  ;;  %v5310_v15 = vld [vmem:[#allocation5 + $0x130] ss:$28 sps:$4 sm:$0xff]   ;;  %v5313_v17 = vld [vmem:[#allocation5 + $0x164] ss:$28 sps:$4 sm:$0xff]  }
 0x40f   :  { %3720 = vmatpush1.bf16.msra.mxu0 %v5233_v18  ;;  %3802 = vmatpush1.bf16.msra.mxu1 %v5236_v19  ;;  %v5314_v18 = vld [vmem:[#allocation5 + $0x328] ss:$28 sps:$4 sm:$0xff]   ;;  %v5311_v19 = vld [vmem:[#allocation5 + $0x160] ss:$28 sps:$4 sm:$0xff]  }
 0x410   :  { %3721 = vmatprep.subr.bf16.mxu0 %v5241_v20  ;;  %3803 = vmatprep.subr.bf16.mxu1 %v5244_v23  ;;  %v5315_v20 = vld [vmem:[#allocation5 + $0x168] ss:$28 sps:$4 sm:$0xff]   ;;  %v5318_v23 = vld [vmem:[#allocation5 + $0x19c] ss:$28 sps:$4 sm:$0xff]  }
 0x413   :  { %3722 = vmatpush1.bf16.msra.mxu0 %v5239_v24  ;;  %3804 = vmatpush1.bf16.msra.mxu1 %v5242_v25  ;;  %v5319_v24 = vld [vmem:[#allocation5 + $0x360] ss:$28 sps:$4 sm:$0xff]   ;;  %v5316_v25 = vld [vmem:[#allocation5 + $0x198] ss:$28 sps:$4 sm:$0xff]  }
 0x414   :  { %3723 = vmatprep.subr.bf16.mxu0 %v5247_v26  ;;  %3805 = vmatprep.subr.bf16.mxu1 %v5250_v27  ;;  %v5320_v26 = vld [vmem:[#allocation5 + $0x1a0] ss:$28 sps:$4 sm:$0xff]   ;;  %v5323_v27 = vld [vmem:[#allocation5 + $0x1d4] ss:$28 sps:$4 sm:$0xff]  }
 0x417   :  { %3724 = vmatpush1.bf16.msra.mxu0 %v5245_v63  ;;  %3806 = vmatpush1.bf16.msra.mxu1 %v5248_v28  ;;  %v5324_v63 = vld [vmem:[#allocation5 + $0x558] ss:$28 sps:$4 sm:$0xff]   ;;  %v5321_v28 = vld [vmem:[#allocation5 + $0x1d0] ss:$28 sps:$4 sm:$0xff]  }
 0x418   :  { %3725 = vmatprep.subr.bf16.mxu0 %v5253_v29  ;;  %3807 = vmatprep.subr.bf16.mxu1 %v5256_v30  ;;  %v5325_v29 = vld [vmem:[#allocation5 + $0x398] ss:$28 sps:$4 sm:$0xff]   ;;  %v5328_v30 = vld [vmem:[#allocation5 + $0x20c] ss:$28 sps:$4 sm:$0xff]  }
 0x41b   :  { %3726 = vmatpush1.bf16.msra.mxu0 %v5251_v31  ;;  %3808 = vmatpush1.bf16.msra.mxu1 %v5254_v32  ;;  %v5329_v31 = vld [vmem:[#allocation5 + $0x590] ss:$28 sps:$4 sm:$0xff]   ;;  %v5326_v32 = vld [vmem:[#allocation5 + $0x208] ss:$28 sps:$4 sm:$0xff]  }
 0x41c   :  { %3727 = vmatprep.subr.bf16.mxu0 %v5259_v33  ;;  %3809 = vmatprep.subr.bf16.mxu1 %v5262_v34  ;;  %v5330_v33 = vld [vmem:[#allocation5 + $0x3d0] ss:$28 sps:$4 sm:$0xff]   ;;  %v5333_v34 = vld [vmem:[#allocation5 + $0x244] ss:$28 sps:$4 sm:$0xff]  }
 0x41f   :  { %3728 = vmatpush1.bf16.msra.mxu0 %v5257_v35  ;;  %3810 = vmatpush1.bf16.msra.mxu1 %v5260_v36  ;;  %v5334_v35 = vld [vmem:[#allocation5 + $0x5c8] ss:$28 sps:$4 sm:$0xff]   ;;  %v5331_v36 = vld [vmem:[#allocation5 + $0x240] ss:$28 sps:$4 sm:$0xff]  }
 0x420   :  { %3729 = vmatprep.subr.bf16.mxu0 %v5265_v37  ;;  %3811 = vmatprep.subr.bf16.mxu1 %v5268_v41  ;;  %v5335_v37 = vld [vmem:[#allocation5 + $0x408] ss:$28 sps:$4 sm:$0xff]   ;;  %v5338_v41 = vld [vmem:[#allocation5 + $0x27c] ss:$28 sps:$4 sm:$0xff]  }
 0x423   :  { %3730 = vmatpush1.bf16.msra.mxu0 %v5263_v42  ;;  %3812 = vmatpush1.bf16.msra.mxu1 %v5266_v43  ;;  %v5339_v42 = vld [vmem:[#allocation5 + $0x600] ss:$28 sps:$4 sm:$0xff]   ;;  %v5336_v43 = vld [vmem:[#allocation5 + $0x278] ss:$28 sps:$4 sm:$0xff]  }
 0x424   :  { %3731 = vmatprep.subr.bf16.mxu0 %v5271_v44  ;;  %3813 = vmatprep.subr.bf16.mxu1 %v5274_v47  ;;  %v5340_v44 = vld [vmem:[#allocation5 + $0x440] ss:$28 sps:$4 sm:$0xff]   ;;  %v5343_v47 = vld [vmem:[#allocation5 + $0x2b4] ss:$28 sps:$4 sm:$0xff]  }
 0x427   :  { %3732 = vmatpush1.bf16.msra.mxu0 %v5269_v48  ;;  %3814 = vmatpush1.bf16.msra.mxu1 %v5272_v49  ;;  %v5344_v48 = vld [vmem:[#allocation5 + $0x638] ss:$28 sps:$4 sm:$0xff]   ;;  %v5341_v49 = vld [vmem:[#allocation5 + $0x2b0] ss:$28 sps:$4 sm:$0xff]  }
 0x428   :  { %3733 = vmatprep.subr.bf16.mxu0 %v5277_v50  ;;  %3815 = vmatprep.subr.bf16.mxu1 %v5280_v52  ;;  %v5345_v50 = vld [vmem:[#allocation5 + $0x478] ss:$28 sps:$4 sm:$0xff]   ;;  %v5348_v52 = vld [vmem:[#allocation5 + $0x2ec] ss:$28 sps:$4 sm:$0xff]  }
 0x42b   :  { %3734 = vmatpush1.bf16.msra.mxu0 %v5275_v53  ;;  %3816 = vmatpush1.bf16.msra.mxu1 %v5278_v54  ;;  %v5349_v53 = vld [vmem:[#allocation5 + $0x670] ss:$28 sps:$4 sm:$0xff]   ;;  %v5346_v54 = vld [vmem:[#allocation5 + $0x2e8] ss:$28 sps:$4 sm:$0xff]  }
 0x42c   :  { %3826 = vmatprep.subr.bf16.mxu0 %v5283_v55  ;;  %4614 = vmatprep.subr.bf16.mxu1 %v5284_v56  ;;  %v5353_v55 = vld [vmem:[#allocation5 + $0x324] ss:$28 sps:$4 sm:$0xff]  }
 0x42d   :  { %v5354_v56 = vld [vmem:[#allocation5 + $0x6a8] ss:$28 sps:$4 sm:$0xff]  }
 0x42e   :  { %3736 = vmatmul.mubr.bf16.vlgmr.msra.gmra.mrb[8].mxu0 %v5836_v58  ;;  %3818 = vmatmul.mubr.bf16.vlgmr.msra.gmra.mrb[12].mxu1 %v5836_v58 }
 0x42f   :  { %3827 = vmatpush1.bf16.msra.mxu0 %v5281_v57  ;;  %3858 = vmatprep.mubr.bf16.mxu0 %v5825_v46  ;;  %v5351_v57 = vld [vmem:[#allocation5 + $0x320] ss:$28 sps:$4 sm:$0xff]  }
 0x430   :  { %4615 = vmatpush3.bf16.msra.mxu1 %v5285_v59  ;;  %3940 = vmatprep.mubr.bf16.mxu1 %v5825_v46  ;;  %v5304_v46 = vld [vmem:[#allocation5 + $0x2b8] ss:$28 sps:$4 sm:$0xff]   ;;  %v5355_v59 = vld [vmem:[#allocation5 + $0x4e8] ss:$28 sps:$4 sm:$0xff]  }
 0x431   :  { %3828 = vmatprep.subr.bf16.mxu0 %v5288_v60  ;;  %4616 = vmatprep.subr.bf16.mxu1 %v5289_v61  ;;  %v5358_v60 = vld [vmem:[#allocation5 + $0x35c] ss:$28 sps:$4 sm:$0xff]  }
 0x432   :  { %v5359_v61 = vld [vmem:[#allocation5 + $0x6e0] ss:$28 sps:$4 sm:$0xff]  }
 0x433   :  { %3829 = vmatpush1.bf16.msra.mxu0 %v5286_v40  ;;  %v5356_v40 = vld [vmem:[#allocation5 + $0x358] ss:$28 sps:$4 sm:$0xff]  }
 0x434   :  { %4617 = vmatpush3.bf16.msra.mxu1 %v5290_v62  ;;  %3830 = vmatprep.subr.bf16.mxu0 %v5293_v1  ;;  %v5360_v62 = vld [vmem:[#allocation5 + $0x520] ss:$28 sps:$4 sm:$0xff]   ;;  %v5363_v1 = vld [vmem:[#allocation5 + $0x394] ss:$28 sps:$4 sm:$0xff]  }
 0x435   :  { %4618 = vmatprep.subr.bf16.mxu1 %v5294_v2  ;;  %v5361_v2 = vld [vmem:[#allocation5 + $0x390] ss:$28 sps:$4 sm:$0xff]  }
 0x437   :  { %3831 = vmatpush1.bf16.msra.mxu0 %v5291_v3  ;;  %v5366_v3 = vld [vmem:[#allocation5 + $0x3cc] ss:$28 sps:$4 sm:$0xff]  }
 0x438   :  { %4619 = vmatpush3.bf16.msra.mxu1 %v5295_v4  ;;  %3832 = vmatprep.subr.bf16.mxu0 %v5298_v5  ;;  %v5364_v4 = vld [vmem:[#allocation5 + $0x3c8] ss:$28 sps:$4 sm:$0xff]  }
 0x439   :  { %4620 = vmatprep.subr.bf16.mxu1 %v5299_v6  ;;  %v5369_v5 = vld [vmem:[#allocation5 + $0x404] ss:$28 sps:$4 sm:$0xff]  }
 0x43a   :  { %v5367_v6 = vld [vmem:[#allocation5 + $0x400] ss:$28 sps:$4 sm:$0xff]  }
 0x43b   :  { %3833 = vmatpush1.bf16.msra.mxu0 %v5296_v7  ;;  %v5372_v7 = vld [vmem:[#allocation5 + $0x43c] ss:$28 sps:$4 sm:$0xff]  }
 0x43c   :  { %4621 = vmatpush3.bf16.msra.mxu1 %v5300_v8  ;;  %3834 = vmatprep.subr.bf16.mxu0 %v5303_v9  ;;  %v5370_v8 = vld [vmem:[#allocation5 + $0x438] ss:$28 sps:$4 sm:$0xff]  }
 0x43d   :  { %4622 = vmatprep.subr.bf16.mxu1 %v5304_v46  ;;  %v5375_v9 = vld [vmem:[#allocation5 + $0x474] ss:$28 sps:$4 sm:$0xff]  }
 0x43e   :  { %v5373_v46 = vld [vmem:[#allocation5 + $0x470] ss:$28 sps:$4 sm:$0xff]  }
 0x43f   :  { %3835 = vmatpush1.bf16.msra.mxu0 %v5301_v10  ;;  %v5376_v10 = vld [vmem:[#allocation5 + $0x4a8] ss:$28 sps:$4 sm:$0xff]  }
 0x440   :  { %4623 = vmatpush3.bf16.msra.mxu1 %v5305_v11  ;;  %3836 = vmatprep.subr.bf16.mxu0 %v5308_v12  ;;  %v5381_v11 = vld [vmem:[#allocation5 + $0x4e4] ss:$28 sps:$4 sm:$0xff]   ;;  %v5384_v12 = vld [vmem:[#allocation5 + $0x51c] ss:$28 sps:$4 sm:$0xff]  }
 0x441   :  { %4624 = vmatprep.subr.bf16.mxu1 %v5309_v13  ;;  %v5382_v13 = vld [vmem:[#allocation5 + $0x518] ss:$28 sps:$4 sm:$0xff]  }
 0x443   :  { %3837 = vmatpush1.bf16.msra.mxu0 %v5306_v14  ;;  %v5387_v14 = vld [vmem:[#allocation5 + $0x554] ss:$28 sps:$4 sm:$0xff]  }
 0x444   :  { %4625 = vmatpush3.bf16.msra.mxu1 %v5310_v15  ;;  %3838 = vmatprep.subr.bf16.mxu0 %v5313_v17  ;;  %v5385_v15 = vld [vmem:[#allocation5 + $0x550] ss:$28 sps:$4 sm:$0xff]  }
 0x445   :  { %4626 = vmatprep.subr.bf16.mxu1 %v5314_v18  ;;  %v5390_v17 = vld [vmem:[#allocation5 + $0x58c] ss:$28 sps:$4 sm:$0xff]  }
 0x446   :  { %v5388_v18 = vld [vmem:[#allocation5 + $0x588] ss:$28 sps:$4 sm:$0xff]  }
 0x447   :  { %3839 = vmatpush1.bf16.msra.mxu0 %v5311_v19  ;;  %v5393_v19 = vld [vmem:[#allocation5 + $0x5c4] ss:$28 sps:$4 sm:$0xff]  }
 0x448   :  { %4627 = vmatpush3.bf16.msra.mxu1 %v5315_v20  ;;  %3840 = vmatprep.subr.bf16.mxu0 %v5318_v23  ;;  %v5391_v20 = vld [vmem:[#allocation5 + $0x5c0] ss:$28 sps:$4 sm:$0xff]  }
 0x449   :  { %4628 = vmatprep.subr.bf16.mxu1 %v5319_v24  ;;  %v5396_v23 = vld [vmem:[#allocation5 + $0x5fc] ss:$28 sps:$4 sm:$0xff]  }
 0x44a   :  { %v5394_v24 = vld [vmem:[#allocation5 + $0x5f8] ss:$28 sps:$4 sm:$0xff]  }
 0x44b   :  { %3841 = vmatpush1.bf16.msra.mxu0 %v5316_v25  ;;  %v5399_v25 = vld [vmem:[#allocation5 + $0x634] ss:$28 sps:$4 sm:$0xff]  }
 0x44c   :  { %4629 = vmatpush3.bf16.msra.mxu1 %v5320_v26  ;;  %3842 = vmatprep.subr.bf16.mxu0 %v5323_v27  ;;  %v5397_v26 = vld [vmem:[#allocation5 + $0x630] ss:$28 sps:$4 sm:$0xff]  }
 0x44d   :  { %4636 = vmatprep.subr.bf16.mxu1 %v5324_v63  ;;  %v5402_v27 = vld [vmem:[#allocation5 + $0x66c] ss:$28 sps:$4 sm:$0xff]  }
 0x44e   :  { %v5400_v63 = vld [vmem:[#allocation5 + $0x668] ss:$28 sps:$4 sm:$0xff]  }
 0x44f   :  { %3941 = vmatmul.mubr.bf16.vlgmr.msra.gmra.mrb[16].mxu1 %v5823_v45  ;;  %3843 = vmatpush1.bf16.msra.mxu0 %v5321_v28  ;;  %v5405_v28 = vld [vmem:[#allocation5 + $0x6a4] ss:$28 sps:$4 sm:$0xff]  }
 0x450   :  { %4637 = vmatpush3.bf16.msra.mxu1 %v5325_v29  ;;  %3980 = vmatprep.mubr.bf16.mxu1 %v5829_v51  ;;  %v5403_v29 = vld [vmem:[#allocation5 + $0x6a0] ss:$28 sps:$4 sm:$0xff]  }
 0x451   :  { %3844 = vmatprep.subr.bf16.mxu0 %v5328_v30  ;;  %4638 = vmatprep.subr.bf16.mxu1 %v5329_v31  ;;  %v5408_v30 = vld [vmem:[#allocation5 + $0x6dc] ss:$28 sps:$4 sm:$0xff]  }
 0x452   :  { %v5406_v31 = vld [vmem:[#allocation5 + $0x6d8] ss:$28 sps:$4 sm:$0xff]  }
 0x453   :  { %3845 = vmatpush1.bf16.msra.mxu0 %v5326_v32  ;;  %v5851_v32 = vld [vmem:[%s5900_s9] sm:$0xff]  ;;  %s5545_s9 = smov [#allocation8]  }
 0x454   :  { %4639 = vmatpush3.bf16.msra.mxu1 %v5330_v33  ;;  %3846 = vmatprep.subr.bf16.mxu0 %v5333_v34  ;;  %v2478_v33 = vrot.slane %v5851_v32, %v5776_v22  ;;  %v2486_v34 = vrot.slane %v5851_v32, %v5789_v38  ;;  %s4061_s1 = sshll.u32 %s5545_s9, 4  ;;  %s4062_s1 = int_to_ptr.vmem [resolvable:$true] %s4061_s1 }
 0x455   :  { %4640 = vmatprep.subr.bf16.mxu1 %v5334_v35  ;;  %v2482_v35 = vrot.slane %v5851_v32, %v5782_v16  ;;  %s5484_s18 = scalar_lea.vmem %s4062_s1, 128  ;;  %p5489_p3 = scmp.lt.s32.totalorder %s4062_s1, %s4062_s1 }
 0x456   :  { %p5485_p2 = scmp.ne.s32.totalorder %s4062_s1, %s5484_s18  ;;  %p5490_p4 = scmp.lt.s32.totalorder %s5484_s18, %s5484_s18 }
 0x457   :  { %3847 = vmatpush1.bf16.msra.mxu0 %v5331_v36  ;;  %v2490_v36 = vrot.slane %v5851_v32, %v5792_v39 }
 0x458   :  { %4641 = vmatpush3.bf16.msra.mxu1 %v5335_v37  ;;  %3848 = vmatprep.subr.bf16.mxu0 %v5338_v41  ;;  %p5491_p5 = por %p5490_p4, %p5489_p3 }
 0x459   :  { %4642 = vmatprep.subr.bf16.mxu1 %v5339_v42 }
 0x45a   :  { %p5492_p6 = pnand %p5491_p5, %p5485_p2 }
 0x45b   :  { %3849 = vmatpush1.bf16.msra.mxu0 %v5336_v43 }
 0x45c   :  { %4643 = vmatpush3.bf16.msra.mxu1 %v5340_v44  ;;  %3850 = vmatprep.subr.bf16.mxu0 %v5343_v47 }
 0x45d   :  { %4644 = vmatprep.subr.bf16.mxu1 %v5344_v48 }
 0x45f   :  { %3851 = vmatpush1.bf16.msra.mxu0 %v5341_v49 }
 0x460   :  { %4645 = vmatpush3.bf16.msra.mxu1 %v5345_v50  ;;  %3852 = vmatprep.subr.bf16.mxu0 %v5348_v52 }
 0x461   :  { %4646 = vmatprep.subr.bf16.mxu1 %v5349_v53 }
 0x463   :  { %3853 = vmatpush1.bf16.msra.mxu0 %v5346_v54 }
 0x464   :  { %4647 = vmatpush3.bf16.msra.mxu1 %v5350_v0  ;;  %3854 = vmatprep.subr.bf16.mxu0 %v5353_v55 }
 0x465   :  { %4648 = vmatprep.subr.bf16.mxu1 %v5354_v56 }
 0x467   :  { %3855 = vmatpush1.bf16.msra.mxu0 %v5351_v57 }
 0x468   :  { %4649 = vmatpush3.bf16.msra.mxu1 %v5355_v59  ;;  %3856 = vmatprep.subr.bf16.mxu0 %v5358_v60 }
 0x469   :  { %4650 = vmatprep.subr.bf16.mxu1 %v5359_v61 }
 0x46b   :  { %3857 = vmatpush1.bf16.msra.mxu0 %v5356_v40 }
 0x46c   :  { %4651 = vmatpush3.bf16.msra.mxu1 %v5360_v62  ;;  %3867 = vmatprep.subr.bf16.mxu0 %v5363_v1 }
 0x46e   :  { %3859 = vmatmul.mubr.bf16.vlgmr.msra.gmra.mrb[12].mxu0 %v5823_v45  ;;  %v5378_v45 = vld [vmem:[#allocation5 + $0x4ac] ss:$28 sps:$4 sm:$0xff]  }
 0x46f   :  { %3981 = vmatmul.mubr.bf16.vlgmr.msra.gmra.mrb[20].mxu1 %v5836_v58  ;;  %3868 = vmatpush1.bf16.msra.mxu0 %v5361_v2 }
 0x470   :  { %3899 = vmatprep.mubr.bf16.mxu0 %v5829_v51  ;;  %3869 = vmatprep.subr.bf16.mxu0 %v5366_v3  ;;  %v5379_v51 = vld [vmem:[#allocation5 + $0x4e0] ss:$28 sps:$4 sm:$0xff]  }
 0x473   :  { %3870 = vmatpush1.bf16.msra.mxu0 %v5364_v4 }
 0x474   :  { %3871 = vmatprep.subr.bf16.mxu0 %v5369_v5 }
 0x477   :  { %3872 = vmatpush1.bf16.msra.mxu0 %v5367_v6 }
 0x478   :  { %3873 = vmatprep.subr.bf16.mxu0 %v5372_v7 }
 0x47b   :  { %3874 = vmatpush1.bf16.msra.mxu0 %v5370_v8 }
 0x47c   :  { %3875 = vmatprep.subr.bf16.mxu0 %v5375_v9 }
 0x47f   :  { %3876 = vmatpush1.bf16.msra.mxu0 %v5373_v46 }
 0x480   :  { %3877 = vmatprep.subr.bf16.mxu0 %v5378_v45 }
 0x483   :  { %3878 = vmatpush1.bf16.msra.mxu0 %v5376_v10 }
 0x484   :  { %3879 = vmatprep.subr.bf16.mxu0 %v5381_v11 }
 0x487   :  { %3880 = vmatpush1.bf16.msra.mxu0 %v5379_v51 }
 0x488   :  { %3881 = vmatprep.subr.bf16.mxu0 %v5384_v12 }
 0x48b   :  { %3882 = vmatpush1.bf16.msra.mxu0 %v5382_v13 }
 0x48c   :  { %3883 = vmatprep.subr.bf16.mxu0 %v5387_v14 }
 0x48f   :  { %3884 = vmatpush1.bf16.msra.mxu0 %v5385_v15 }
 0x490   :  { %3885 = vmatprep.subr.bf16.mxu0 %v5390_v17 }
 0x493   :  { %3886 = vmatpush1.bf16.msra.mxu0 %v5388_v18 }
 0x494   :  { %3887 = vmatprep.subr.bf16.mxu0 %v5393_v19 }
 0x497   :  { %3888 = vmatpush1.bf16.msra.mxu0 %v5391_v20 }
 0x498   :  { %3889 = vmatprep.subr.bf16.mxu0 %v5396_v23 }
 0x49b   :  { %3890 = vmatpush1.bf16.msra.mxu0 %v5394_v24 }
 0x49c   :  { %3891 = vmatprep.subr.bf16.mxu0 %v5399_v25 }
 0x49f   :  { %3892 = vmatpush1.bf16.msra.mxu0 %v5397_v26 }
 0x4a0   :  { %3893 = vmatprep.subr.bf16.mxu0 %v5402_v27 }
 0x4a3   :  { %3894 = vmatpush1.bf16.msra.mxu0 %v5400_v63 }
 0x4a4   :  { %3895 = vmatprep.subr.bf16.mxu0 %v5405_v28 }
 0x4a7   :  { %3896 = vmatpush1.bf16.msra.mxu0 %v5403_v29 }
 0x4a8   :  { %3897 = vmatprep.subr.bf16.mxu0 %v5408_v30 }
 0x4ab   :  { %3898 = vmatpush1.bf16.msra.mxu0 %v5406_v31 }
 0x4ae   :  { %3900 = vmatmul.mubr.bf16.vlgmr.msra.gmra.mrb[12].mxu0 %v5836_v58 }
 0x501   :  { %v3737_v37 = vpop.f32.mrb[8].mxu0  ;;  %v3819_v41 = vpop.f32.mrb[12].mxu1 }
 0x502   :  { %v4664_v58 = vadd.f32 %v3737_v37, %v2478_v33  ;;  %v4666_v42 = vadd.f32 %v3819_v41, %v2486_v34  ;;  %v3739_v43 = vpop.f32.mrb[9].mxu0  ;;  %v3821_v44 = vpop.f32.mrb[13].mxu1 }
 0x503   :  { %v4665_v47 = vadd.f32 %v3739_v43, %v2482_v35  ;;  %v4667_v48 = vadd.f32 %v3821_v44, %v2490_v36  ;;  %v3741_v49 = vpop.f32.mrb[10].mxu0  ;;  %v3823_v50 = vpop.f32.mrb[14].mxu1 }
 0x504   :  { %v4563_v22 = vmul.f32 -1.442695, %v4664_v58  ;;  %v4565_v52 = vmul.f32 -1.442695, %v4666_v42  ;;  %v3742_v53 = vpop.f32.mrb[11].mxu0  ;;  %v3824_v38 = vpop.f32.mrb[15].mxu1 }
 0x505   :  { %v4564_v54 = vmul.f32 -1.442695, %v4665_v47  ;;  %v4566_v0 = vmul.f32 -1.442695, %v4667_v48 }
 0x506   :  { %5411 = vpow2.f32 %v4563_v22 }
 0x507   :  { %5413 = vpow2.f32 %v4565_v52 }
 0x508   :  { %5415 = vpow2.f32 %v4564_v54 }
 0x509   :  { %5417 = vpow2.f32 %v4566_v0 }
 0x510   :  { %v5412_v16 = vpop.eup %5411 }
 0x511   :  { %v5414_v39 = vpop.eup %5413  ;;  %v4009_v55 = vadd.f32 1.0, %v5412_v16 }
 0x512   :  { %v5416_v56 = vpop.eup %5415  ;;  %v4011_v57 = vadd.f32 1.0, %v5414_v39 }
 0x513   :  { %v5418_v59 = vpop.eup %5417  ;;  %5419 = vrcp.f32 %v4009_v55  ;;  %v4010_v60 = vadd.f32 1.0, %v5416_v56 }
 0x514   :  { %5421 = vrcp.f32 %v4011_v57  ;;  %v4012_v61 = vadd.f32 1.0, %v5418_v59 }
 0x515   :  { %5423 = vrcp.f32 %v4010_v60 }
 0x516   :  { %5425 = vrcp.f32 %v4012_v61 }
 0x51d   :  { %v5420_v40 = vpop.eup %5419 }
 0x51e   :  { %v5422_v62 = vpop.eup %5421  ;;  %4030 = vst [vmem:[#allocation7] sm:$0xff] %v5420_v40 }
 0x51f   :  { %v5424_v1 = vpop.eup %5423  ;;  %4032 = vst [vmem:[#allocation7 + $0x10] sm:$0xff] %v5422_v62 }
 0x520   :  { %v5426_v2 = vpop.eup %5425  ;;  %4031 = vst [vmem:[#allocation7 + $0x8] sm:$0xff] %v5424_v1 }
 0x521   :  { %4033 = vst [vmem:[#allocation7 + $0x18] sm:$0xff] %v5426_v2 }
 0x522   :  { %v4630_v3 = vpop.f32.mrb[16].mxu1 }
 0x523   :  { %5495 = shalt.err (!%p5492_p6)
}
 0x524   :  { %s5496_s24 = scalar_lea.hbm %s5902_s11, 128 }
 0x525   :  { %p5497_p7 = scmp.ne.s32.totalorder %s5902_s11, %s5496_s24  ;;  %p5500_p8 = scmp.lt.u32.totalorder %s5496_s24, %s5902_s11 }
 0x527   :  { %p5502_p9 = pnand %p5500_p8, %p5497_p7 }
 0x529   :  { %5505 = shalt.err (!%p5502_p9)
}
 0x52a   :  { %4064 = dma.vmem_to_hbm [thread:$0]  %s4062_s1, 128, %s5902_s11, [#allocation9]   ;;  %v4631_v4 = vpop.f32.mrb[17].mxu1  ;;  %v2501_v8 = vsub.s32 6, %v5773_v21  ;;  %v2493_v19 = vsub.s32 4, %v5773_v21  ;;  %v2497_v20 = vsub.s32 5, %v5773_v21 }
 0x52b   :  { %v4632_v5 = vadd.f32 %v4631_v4, %v4630_v3  ;;  %v4633_v6 = vpop.f32.mrb[18].mxu1  ;;  %s5546_s11 = smov [#allocation7]  }
 0x52c   :  { %v4634_v7 = vpop.f32.mrb[19].mxu1  ;;  %v2502_v9 = vrot.slane %v5851_v32, %v2501_v8  ;;  %v2494_v23 = vrot.slane %v5851_v32, %v2493_v19  ;;  %v2498_v24 = vrot.slane %v5851_v32, %v2497_v20  ;;  %s4051_s30 = sshll.u32 %s5546_s11, 4  ;;  %s4052_s30 = int_to_ptr.vmem [resolvable:$true] %s4051_s30 }
 0x52d   :  { %s5506_s12 = scalar_lea.vmem %s4052_s30, 896  ;;  %p5511_p11 = scmp.lt.s32.totalorder %s4052_s30, %s4052_s30 }
 0x52e   :  { %v3943_v10 = vadd.f32 %v4632_v5, %v2502_v9  ;;  %p5507_p10 = scmp.ne.s32.totalorder %s4052_s30, %s5506_s12  ;;  %p5512_p12 = scmp.lt.s32.totalorder %s5506_s12, %s5506_s12 }
 0x530   :  { %p5513_p13 = por %p5512_p12, %p5511_p11 }
 0x532   :  { %p5514_p0 = pnand %p5513_p13, %p5507_p10 }
 0x542   :  { %v4652_v46 = vpop.f32.mrb[20].mxu1 }
 0x543   :  { %v4653_v45 = vpop.f32.mrb[21].mxu1 }
 0x544   :  { %v4654_v11 = vadd.f32 %v4653_v45, %v4652_v46  ;;  %v4655_v51 = vpop.f32.mrb[22].mxu1 }
 0x545   :  { %v4656_v12 = vpop.f32.mrb[23].mxu1 }
 0x546   :  { %v3983_v13 = vadd.f32 %v4654_v11, %v3943_v10 }
 0x548   :  { %v4569_v14 = vmul.f32 -1.442695, %v3983_v13 }
 0x54a   :  { %5427 = vpow2.f32 %v4569_v14 }
 0x554   :  { %v5428_v15 = vpop.eup %5427 }
 0x555   :  { %v4015_v17 = vadd.f32 1.0, %v5428_v15 }
 0x557   :  { %5429 = vrcp.f32 %v4015_v17 }
 0x561   :  { %v5430_v18 = vpop.eup %5429 }
 0x562   :  { %4036 = vst [vmem:[#allocation7 + $0x30] sm:$0xff] %v5430_v18 }
 0x581   :  { %v3901_v25 = vpop.f32.mrb[12].mxu0 }
 0x582   :  { %v4668_v26 = vadd.f32 %v3901_v25, %v2494_v23  ;;  %v3903_v27 = vpop.f32.mrb[13].mxu0 }
 0x583   :  { %v4669_v63 = vadd.f32 %v3903_v27, %v2498_v24  ;;  %v3905_v28 = vpop.f32.mrb[14].mxu0 }
 0x584   :  { %v4567_v29 = vmul.f32 -1.442695, %v4668_v26  ;;  %v3906_v30 = vpop.f32.mrb[15].mxu0 }
 0x585   :  { %v4568_v31 = vmul.f32 -1.442695, %v4669_v63 }
 0x586   :  { %5431 = vpow2.f32 %v4567_v29 }
 0x587   :  { %5433 = vpow2.f32 %v4568_v31 }
 0x590   :  { %v5432_v33 = vpop.eup %5431 }
 0x591   :  { %v5434_v34 = vpop.eup %5433  ;;  %v4013_v35 = vadd.f32 1.0, %v5432_v33 }
 0x592   :  { %v4014_v36 = vadd.f32 1.0, %v5434_v34 }
 0x593   :  { %5435 = vrcp.f32 %v4013_v35 }
 0x594   :  { %5437 = vrcp.f32 %v4014_v36 }
 0x59d   :  { %v5436_v21 = vpop.eup %5435 }
 0x59e   :  { %v5438_v32 = vpop.eup %5437  ;;  %4034 = vst [vmem:[#allocation7 + $0x20] sm:$0xff] %v5436_v21 }
 0x59f   :  { %4035 = vst [vmem:[#allocation7 + $0x28] sm:$0xff] %v5438_v32 }
 0x5a0   :  { %5517 = shalt.err (!%p5514_p0)
}
 0x5a1   :  { %s5518_s15 = scalar_lea.hbm %s5901_s10, 896 }
 0x5a2   :  { %p5519_p1 = scmp.ne.s32.totalorder %s5901_s10, %s5518_s15  ;;  %p5522_p2 = scmp.lt.u32.totalorder %s5518_s15, %s5901_s10 }
 0x5a4   :  { %p5524_p3 = pnand %p5522_p2, %p5519_p1 }
 0x5a6   :  { %5527 = shalt.err (!%p5524_p3)
}
 0x5a7   :  { %4054 = dma.vmem_to_hbm [thread:$0]  %s4052_s30, 896, %s5901_s10, [#allocation4]  }
 0x5a8   :  { %5532 = dma.done.wait [#allocation4], 896  }
 0x5a9   :  { %5533 = vsyncadd [#allocation4], 4294966400 }
 0x5aa   :  { %5534 = dma.done.wait [#allocation9], 128  }
 0x5ab   :  { %5535 = vsyncadd [#allocation9], 4294967168 }
 0x5ac   :  { %4071 = vsyncpa [#allocation3], 1 }
 0x5ad   :  { %4072 = vsyncpa [#allocation6], 1 }
 0x5ae   :  { %4073 = vsyncpa [#allocation4], 1 }
 0x5af   :  { %4074 = vsyncpa [#allocation9], 1 }

</bundles_post_ra>
